<compile_context>
chip_gen: v6e
topology: v6e:2x2x1
jax: 0.10.0
libtpu: 0.0.40
codegen_flags: <defaults>
</compile_context>

<pallas_src>
import math
from functools import partial

import jax
import jax.numpy as jnp
from jax.experimental import pallas as pl
from jax.experimental.pallas import tpu as pltpu

EPS = 1e-5  # PyTorch LayerNorm default eps


# ------------------------------------------------------------------ in-kernel helpers
def _layernorm(x, w, b):
    mu = jnp.mean(x, axis=-1, keepdims=True)
    var = jnp.mean(jnp.square(x - mu), axis=-1, keepdims=True)
    return (x - mu) * jax.lax.rsqrt(var + EPS) * w + b


def _gelu_tanh(x):
    # tanh approximation of GELU (EUP tanh + a few VALU ops); error vs exact
    # GELU is ~1e-3, well inside the bf16 tolerance used below.
    c = math.sqrt(2.0 / math.pi)
    return 0.5 * x * (1.0 + jnp.tanh(c * (x + 0.044715 * x * x * x)))


def _bf16_dot(a, w_bf16):
    # bf16 MXU inputs, f32 accumulation.
    return jnp.dot(a.astype(jnp.bfloat16), w_bf16, preferred_element_type=jnp.float32)


# ------------------------------------------------------------------ fused kernel
# grid = (B, n_layers); one kernel step = one transformer layer of one batch
# element.  The activation x for the current batch element is carried across
# the layer axis in x_scr (VMEM scratch); per-layer weights arrive as streamed
# (1, ...) blocks selected by the layer grid index.
def _vit_kernel(
    patch_ref, wpat_ref, pos_ref, lnpre_w, lnpre_b,
    ln1w, ln1b, wqkv, bqkv, wo, bo,
    ln2w, ln2b, wfc, bfc, wpr, bpr,
    lnpost_w, lnpost_b, proj_ref,
    out_ref,
    x_scr, o_scr, *, n_head):
    l = pl.program_id(1)
    D = pos_ref.shape[-1]
    dh = D // n_head
    scale = 1.0 / math.sqrt(dh)

    # ---- first layer of this batch element: patch embed + pos emb + ln_pre
    @pl.when(l == 0)
    def _():
        e = jnp.dot(patch_ref[0], wpat_ref[...],
                    preferred_element_type=jnp.float32)          # (L, D)
        e = e + pos_ref[...]                                     # broadcast (L, D)
        x_scr[...] = _layernorm(e, lnpre_w[...], lnpre_b[...])

    x = x_scr[...]

    # ---------------- multi-head self-attention (one batch element) --------
    h = _layernorm(x, ln1w[0], ln1b[0])
    qkv = _bf16_dot(h, wqkv[0]) + bqkv[0]                        # (L, 3D) f32

    # TODO(synk): at real sizes (dh >= 64, D multiple of 128) pack heads into
    # lane-aligned groups / a batched dot_general so the QK^T contraction is
    # >= 128 wide; at this toy size (dh=8) the per-head loop is negligible.
    for hh in range(n_head):
        lo = hh * dh
        qh = qkv[:, lo:lo + dh].astype(jnp.bfloat16)
        kh = qkv[:, D + lo:D + lo + dh].astype(jnp.bfloat16)
        vh = qkv[:, 2 * D + lo:2 * D + lo + dh].astype(jnp.bfloat16)
        s = jax.lax.dot_general(qh, kh, (((1,), (1,)), ((), ())),
                                preferred_element_type=jnp.float32) * scale
        s = s - jnp.max(s, axis=-1, keepdims=True)
        p = jnp.exp(s)
        inv = pl.reciprocal(jnp.sum(p, axis=-1, keepdims=True), approx=True)
        oh = jnp.dot(p.astype(jnp.bfloat16), vh,
                     preferred_element_type=jnp.float32) * inv
        o_scr[:, lo:lo + dh] = oh          # write head slice directly, no concat

    x = x + _bf16_dot(o_scr[...], wo[0]) + bo[0]                 # residual 1

    # ---------------- MLP ----------------
    h2 = _layernorm(x, ln2w[0], ln2b[0])
    m = _gelu_tanh(_bf16_dot(h2, wfc[0]) + bfc[0])
    x = x + _bf16_dot(m, wpr[0]) + bpr[0]                        # residual 2

    x_scr[...] = x                                               # carry to next layer

    # ---- after the last layer: ln_post + zero-padded (lane-dense) proj ----
    @pl.when(l == pl.num_programs(1) - 1)
    def _():
        hp = _layernorm(x, lnpost_w[...], lnpost_b[...])
        out_ref[0] = _bf16_dot(hp, proj_ref[...])                # (L, O_pad) f32


# ------------------------------------------------------------------ wrapper
@partial(jax.jit, static_argnames=("patch_size", "heads"))
def spec_vit_mean_forward(x, params, *, patch_size, heads):
    B, C, T = x.shape
    L = T // patch_size
    CP = C * patch_size
    D = params["pos"].shape[-1]
    O = params["proj"].shape[-1]
    n_layers = params["wqkv_t"].shape[0]
    O_pad = max(128, ((O + 127) // 128) * 128)

    # im2col (stride == kernel Conv1d, bias=False) -> (B, L, C*P), pre-cast to
    # bf16: the first matmul is bf16 anyway and this halves its HBM->VMEM DMA.
    patches = (x.reshape(B, C, L, patch_size)
               .transpose(0, 2, 1, 3)
               .reshape(B, L, CP)).astype(jnp.bfloat16)

    # lane-dense output: zero-pad the projection to a 128-lane multiple,
    # slice the padding back off after the kernel.
    proj_pad = jnp.zeros((D, O_pad), jnp.bfloat16).at[:, :O].set(params["proj"])

    operands = (patches, params["w_pat"], params["pos"],
                params["ln_pre_w"], params["ln_pre_b"],
                params["ln1_w"], params["ln1_b"],
                params["wqkv_t"], params["bqkv"], params["wo_t"], params["bo"],
                params["ln2_w"], params["ln2_b"],
                params["wfc_t"], params["bfc"], params["wpr_t"], params["bpr"],
                params["ln_post_w"], params["ln_post_b"], proj_pad)

    def full(arr):                               # whole array, fetched once
        zeros = (0,) * arr.ndim
        return pl.BlockSpec(tuple(arr.shape), lambda b, l: zeros)

    def per_layer(arr):                          # streamed one layer per grid step
        tail = (0,) * (arr.ndim - 1)
        return pl.BlockSpec((1,) + tuple(arr.shape[1:]), lambda b, l: (l,) + tail)

    in_specs = [
        pl.BlockSpec((1, L, CP), lambda b, l: (b, 0, 0)),        # patches (per-batch)
        full(params["w_pat"]), full(params["pos"]),
        full(params["ln_pre_w"]), full(params["ln_pre_b"]),
        per_layer(params["ln1_w"]), per_layer(params["ln1_b"]),
        per_layer(params["wqkv_t"]), per_layer(params["bqkv"]),
        per_layer(params["wo_t"]), per_layer(params["bo"]),
        per_layer(params["ln2_w"]), per_layer(params["ln2_b"]),
        per_layer(params["wfc_t"]), per_layer(params["bfc"]),
        per_layer(params["wpr_t"]), per_layer(params["bpr"]),
        full(params["ln_post_w"]), full(params["ln_post_b"]),
        full(proj_pad),
    ]

    out = pl.pallas_call(
        partial(_vit_kernel, n_head=heads),
        out_shape=jax.ShapeDtypeStruct((B, L, O_pad), jnp.float32),
        grid_spec=pltpu.PrefetchScalarGridSpec(
            num_scalar_prefetch=0,
            grid=(B, n_layers),
            in_specs=in_specs,
            out_specs=pl.BlockSpec((1, L, O_pad), lambda b, l: (b, 0, 0)),
            scratch_shapes=[pltpu.VMEM((L, D), jnp.float32),     # x carry
                            pltpu.VMEM((L, D), jnp.float32)]),   # head-output slab
        compiler_params=pltpu.CompilerParams(
            dimension_semantics=("parallel", "arbitrary"),
            # explicit scoped-VMEM limit: working set here is << 1 MiB; 32 MiB
            # leaves headroom and stays under every generation's physical VMEM.
            vmem_limit_bytes=32 * 1024 * 1024),
    )(*operands)
    return out[:, :, :O]


# ------------------------------------------------------------------ parameters (deterministic)
def init_params(key, *, spec_size, patch_size, width, layers, heads, mlp_ratio, output_dim):
    D = width
    mlp_width = int(width * mlp_ratio)
    grid = spec_size // patch_size
    scale = D ** -0.5
    ks = iter(jax.random.split(key, 3 + 8 * layers))

    def nrm(shape, s):
        return (s * jax.random.normal(next(ks), shape)).astype(jnp.float32)

    conv_w = nrm((D, 128, patch_size), 0.05)                 # Conv1d weight, bias=False
    pos = nrm((grid, D), scale)                              # positional_embedding (L, D)
    proj = nrm((D, output_dim), scale)                       # final projection

    wqkv_t, bqkv, wo_t, bo = [], [], [], []
    wfc_t, bfc, wpr_t, bpr = [], [], [], []
    for _ in range(layers):
        in_w = nrm((3 * D, D), 0.05); in_b = nrm((3 * D,), 0.02)     # attn.in_proj
        out_w = nrm((D, D), 0.05);    out_b = nrm((D,), 0.02)        # attn.out_proj
        fc_w = nrm((mlp_width, D), 0.05); fc_b = nrm((mlp_width,), 0.02)  # mlp.c_fc
        pr_w = nrm((D, mlp_width), 0.05); pr_b = nrm((D,), 0.02)          # mlp.c_proj
        wqkv_t.append(in_w.T); bqkv.append(in_b.reshape(1, 3 * D))
        wo_t.append(out_w.T);  bo.append(out_b.reshape(1, D))
        wfc_t.append(fc_w.T);  bfc.append(fc_b.reshape(1, mlp_width))
        wpr_t.append(pr_w.T);  bpr.append(pr_b.reshape(1, D))

    bf16 = lambda arrs: jnp.stack(arrs).astype(jnp.bfloat16)   # MXU weights in bf16
    f32s = lambda arrs: jnp.stack(arrs).astype(jnp.float32)
    ones = lambda: jnp.ones((layers, 1, D), jnp.float32)
    zeros = lambda: jnp.zeros((layers, 1, D), jnp.float32)

    return dict(
        w_pat=conv_w.reshape(D, 128 * patch_size).T.astype(jnp.bfloat16),  # (C*P, D)
        pos=pos,
        ln_pre_w=jnp.ones((1, D), jnp.float32), ln_pre_b=jnp.zeros((1, D), jnp.float32),
        ln1_w=ones(), ln1_b=zeros(),
        wqkv_t=bf16(wqkv_t), bqkv=f32s(bqkv),
        wo_t=bf16(wo_t), bo=f32s(bo),
        ln2_w=ones(), ln2_b=zeros(),
        wfc_t=bf16(wfc_t), bfc=f32s(bfc),
        wpr_t=bf16(wpr_t), bpr=f32s(bpr),
        ln_post_w=jnp.ones((1, D), jnp.float32), ln_post_b=jnp.zeros((1, D), jnp.float32),
        proj=proj.astype(jnp.bfloat16),
    )


# ------------------------------------------------------------------ pure-JAX f32 reference
def reference_forward(x, params, *, patch_size, heads):
    def ln(v, w, b):
        mu = jnp.mean(v, axis=-1, keepdims=True)
        var = jnp.mean(jnp.square(v - mu), axis=-1, keepdims=True)
        return (v - mu) * jax.lax.rsqrt(var + EPS) * w + b

    f32 = lambda a: a.astype(jnp.float32)
    B, C, T = x.shape
    L = T // patch_size
    patches = x.reshape(B, C, L, patch_size).transpose(0, 2, 1, 3).reshape(B, L, C * patch_size)
    h = patches @ f32(params["w_pat"]) + params["pos"]
    h = ln(h, params["ln_pre_w"], params["ln_pre_b"])
    D = h.shape[-1]
    dh = D // heads
    n_layers = params["wqkv_t"].shape[0]
    for l in range(n_layers):
        y = ln(h, params["ln1_w"][l], params["ln1_b"][l])
        qkv = y @ f32(params["wqkv_t"][l]) + params["bqkv"][l]
        q, k, v = qkv[..., :D], qkv[..., D:2 * D], qkv[..., 2 * D:]
        q = q.reshape(B, L, heads, dh) / math.sqrt(dh)
        k = k.reshape(B, L, heads, dh)
        v = v.reshape(B, L, heads, dh)
        s = jnp.einsum("bqhd,bkhd->bhqk", q, k)
        p = jax.nn.softmax(s, axis=-1)
        o = jnp.einsum("bhqk,bkhd->bqhd", p, v).reshape(B, L, D)
        h = h + o @ f32(params["wo_t"][l]) + params["bo"][l]
        y2 = ln(h, params["ln2_w"][l], params["ln2_b"][l])
        m = jax.nn.gelu(y2 @ f32(params["wfc_t"][l]) + params["bfc"][l], approximate=False)
        h = h + m @ f32(params["wpr_t"][l]) + params["bpr"][l]
    h = ln(h, params["ln_post_w"], params["ln_post_b"])
    return h @ f32(params["proj"])


# ------------------------------------------------------------------ main
if __name__ == "__main__":
    # Small configuration consistent with the module's __init__.
    B = 2
    spec_size, patch_size = 32, 4        # grid_size = 8 tokens
    width, layers, heads = 32, 2, 4
    mlp_ratio = 4.0
    output_dim = 64
    C = 128                              # Conv1d in_channels is fixed at 128

    key = jax.random.PRNGKey(0)
    kx, kp = jax.random.split(key)
    x = jax.random.normal(kx, (B, C, spec_size), dtype=jnp.float32)

    params = init_params(kp, spec_size=spec_size, patch_size=patch_size, width=width,
                         layers=layers, heads=heads, mlp_ratio=mlp_ratio,
                         output_dim=output_dim)

    out = spec_vit_mean_forward(x, params, patch_size=patch_size, heads=heads)
    out = jax.block_until_ready(out)

    ref = reference_forward(x, params, patch_size=patch_size, heads=heads)
    ref = jax.block_until_ready(ref)

    assert out.shape == (B, spec_size // patch_size, output_dim), out.shape
    max_diff = float(jnp.max(jnp.abs(out - ref)))
    ref_max = float(jnp.max(jnp.abs(ref)))
    # bf16 matmul inputs + tanh-GELU + approx-reciprocal softmax vs an exact
    # f32 reference: scale-aware tolerance (~3% of the output range).
    assert max_diff <= 3e-2 * max(1.0, ref_max), \
        f"mismatch vs reference: max|diff|={max_diff}, max|ref|={ref_max}"

    print("KERNEL_OK")
</pallas_src>

<mosaic_0001>
module attributes {stable_mosaic.version = 11 : i64} {
  func.func @_vit_kernel(%arg0: i32, %arg1: i32, %arg2: memref<1x8x512xbf16, #tpu.memory_space<vmem>>, %arg3: memref<512x32xbf16, #tpu.memory_space<vmem>>, %arg4: memref<8x32xf32, #tpu.memory_space<vmem>>, %arg5: memref<1x32xf32, #tpu.memory_space<vmem>>, %arg6: memref<1x32xf32, #tpu.memory_space<vmem>>, %arg7: memref<1x1x32xf32, #tpu.memory_space<vmem>>, %arg8: memref<1x1x32xf32, #tpu.memory_space<vmem>>, %arg9: memref<1x32x96xbf16, #tpu.memory_space<vmem>>, %arg10: memref<1x1x96xf32, #tpu.memory_space<vmem>>, %arg11: memref<1x32x32xbf16, #tpu.memory_space<vmem>>, %arg12: memref<1x1x32xf32, #tpu.memory_space<vmem>>, %arg13: memref<1x1x32xf32, #tpu.memory_space<vmem>>, %arg14: memref<1x1x32xf32, #tpu.memory_space<vmem>>, %arg15: memref<1x32x128xbf16, #tpu.memory_space<vmem>>, %arg16: memref<1x1x128xf32, #tpu.memory_space<vmem>>, %arg17: memref<1x128x32xbf16, #tpu.memory_space<vmem>>, %arg18: memref<1x1x32xf32, #tpu.memory_space<vmem>>, %arg19: memref<1x32xf32, #tpu.memory_space<vmem>>, %arg20: memref<1x32xf32, #tpu.memory_space<vmem>>, %arg21: memref<32x128xbf16, #tpu.memory_space<vmem>>, %arg22: memref<1x8x128xf32, #tpu.memory_space<vmem>>, %arg23: memref<8x32xf32, #tpu.memory_space<vmem>>, %arg24: memref<8x32xf32, #tpu.memory_space<vmem>>) attributes {dimension_semantics = [#tpu.dimension_semantics<parallel>, #tpu.dimension_semantics<arbitrary>], iteration_bounds = array<i64: 2, 2>, scalar_prefetch = 0 : i64, scratch_operands = 2 : i64, tpu.core_type = #tpu.core_type<tc>, window_params = [{transform_indices = @transform_0, window_bounds = array<i64: 1, 8, 512>}, {pipeline_mode = #tpu.pipeline_mode<synchronous>, transform_indices = @transform_1, window_bounds = array<i64: 512, 32>}, {pipeline_mode = #tpu.pipeline_mode<synchronous>, transform_indices = @transform_2, window_bounds = array<i64: 8, 32>}, {pipeline_mode = #tpu.pipeline_mode<synchronous>, transform_indices = @transform_3, window_bounds = array<i64: 1, 32>}, {pipeline_mode = #tpu.pipeline_mode<synchronous>, transform_indices = @transform_4, window_bounds = array<i64: 1, 32>}, {transform_indices = @transform_5, window_bounds = array<i64: 1, 1, 32>}, {transform_indices = @transform_6, window_bounds = array<i64: 1, 1, 32>}, {transform_indices = @transform_7, window_bounds = array<i64: 1, 32, 96>}, {transform_indices = @transform_8, window_bounds = array<i64: 1, 1, 96>}, {transform_indices = @transform_9, window_bounds = array<i64: 1, 32, 32>}, {transform_indices = @transform_10, window_bounds = array<i64: 1, 1, 32>}, {transform_indices = @transform_11, window_bounds = array<i64: 1, 1, 32>}, {transform_indices = @transform_12, window_bounds = array<i64: 1, 1, 32>}, {transform_indices = @transform_13, window_bounds = array<i64: 1, 32, 128>}, {transform_indices = @transform_14, window_bounds = array<i64: 1, 1, 128>}, {transform_indices = @transform_15, window_bounds = array<i64: 1, 128, 32>}, {transform_indices = @transform_16, window_bounds = array<i64: 1, 1, 32>}, {pipeline_mode = #tpu.pipeline_mode<synchronous>, transform_indices = @transform_17, window_bounds = array<i64: 1, 32>}, {pipeline_mode = #tpu.pipeline_mode<synchronous>, transform_indices = @transform_18, window_bounds = array<i64: 1, 32>}, {pipeline_mode = #tpu.pipeline_mode<synchronous>, transform_indices = @transform_19, window_bounds = array<i64: 32, 128>}, {transform_indices = @transform_20, window_bounds = array<i64: 1, 8, 128>}]} {
    %c0_i32 = arith.constant 0 : i32
    %0 = arith.cmpi eq, %arg1, %c0_i32 : i32
    %1 = arith.extui %0 : i1 to i32
    %c0_i32_0 = arith.constant 0 : i32
    %2 = arith.cmpi ne, %1, %c0_i32_0 : i32
    scf.if %2 {
      %c0_85 = arith.constant 0 : index
      %c0_86 = arith.constant 0 : index
      %c0_87 = arith.constant 0 : index
      %196 = vector.load %arg2[%c0_85, %c0_86, %c0_87] : memref<1x8x512xbf16, #tpu.memory_space<vmem>>, vector<1x8x512xbf16>
      %197 = vector.shape_cast %196 : vector<1x8x512xbf16> to vector<8x512xbf16>
      %c0_88 = arith.constant 0 : index
      %c0_89 = arith.constant 0 : index
      %198 = vector.load %arg3[%c0_88, %c0_89] : memref<512x32xbf16, #tpu.memory_space<vmem>>, vector<512x32xbf16>
      %cst_90 = arith.constant dense<0.000000e+00> : vector<8x32xf32>
      %199 = tpu.matmul %197, %198, %cst_90 {dimension_numbers = #tpu.dot_dimension_numbers<[1], [0], [0], [1], [0, 0, 1, 1], [], []>} : vector<8x512xbf16>, vector<512x32xbf16>, vector<8x32xf32> -> vector<8x32xf32>
      %c0_91 = arith.constant 0 : index
      %c0_92 = arith.constant 0 : index
      %200 = vector.load %arg4[%c0_91, %c0_92] : memref<8x32xf32, #tpu.memory_space<vmem>>, vector<8x32xf32>
      %201 = arith.addf %199, %200 : vector<8x32xf32>
      %c0_93 = arith.constant 0 : index
      %c0_94 = arith.constant 0 : index
      %202 = vector.load %arg5[%c0_93, %c0_94] : memref<1x32xf32, #tpu.memory_space<vmem>>, vector<1x32xf32>
      %c0_95 = arith.constant 0 : index
      %c0_96 = arith.constant 0 : index
      %203 = vector.load %arg6[%c0_95, %c0_96] : memref<1x32xf32, #tpu.memory_space<vmem>>, vector<1x32xf32>
      %cst_97 = arith.constant dense<0.000000e+00> : vector<8xf32>
      %204 = vector.multi_reduction <add>, %201, %cst_97 [1] : vector<8x32xf32> to vector<8xf32>
      %205 = vector.shape_cast %204 : vector<8xf32> to vector<8x1xf32>
      %cst_98 = arith.constant 3.200000e+01 : f32
      %206 = vector.broadcast %cst_98 : f32 to vector<8x1xf32>
      %207 = arith.divf %205, %206 : vector<8x1xf32>
      %208 = vector.broadcast %207 : vector<8x1xf32> to vector<8x32xf32>
      %209 = arith.subf %201, %208 : vector<8x32xf32>
      %210 = arith.mulf %209, %209 : vector<8x32xf32>
      %cst_99 = arith.constant dense<0.000000e+00> : vector<8xf32>
      %211 = vector.multi_reduction <add>, %210, %cst_99 [1] : vector<8x32xf32> to vector<8xf32>
      %212 = vector.shape_cast %211 : vector<8xf32> to vector<8x1xf32>
      %cst_100 = arith.constant 3.200000e+01 : f32
      %213 = vector.broadcast %cst_100 : f32 to vector<8x1xf32>
      %214 = arith.divf %212, %213 : vector<8x1xf32>
      %215 = vector.broadcast %207 : vector<8x1xf32> to vector<8x32xf32>
      %216 = arith.subf %201, %215 : vector<8x32xf32>
      %cst_101 = arith.constant 9.99999974E-6 : f32
      %217 = vector.broadcast %cst_101 : f32 to vector<8x1xf32>
      %218 = arith.addf %214, %217 : vector<8x1xf32>
      %219 = math.rsqrt %218 : vector<8x1xf32>
      %220 = vector.broadcast %219 : vector<8x1xf32> to vector<8x32xf32>
      %221 = arith.mulf %216, %220 : vector<8x32xf32>
      %222 = vector.broadcast %202 : vector<1x32xf32> to vector<8x32xf32>
      %223 = arith.mulf %221, %222 : vector<8x32xf32>
      %224 = vector.broadcast %203 : vector<1x32xf32> to vector<8x32xf32>
      %225 = arith.addf %223, %224 : vector<8x32xf32>
      %c0_102 = arith.constant 0 : index
      %c0_103 = arith.constant 0 : index
      %226 = vector.load %arg23[%c0_102, %c0_103] : memref<8x32xf32, #tpu.memory_space<vmem>>, vector<8x32xf32>
      tpu.vector_store %arg23[%c0_102, %c0_103], %225 {strides = array<i32>} : memref<8x32xf32, #tpu.memory_space<vmem>>, vector<8x32xf32>,
    } else {
    }
    %c0 = arith.constant 0 : index
    %c0_1 = arith.constant 0 : index
    %3 = vector.load %arg23[%c0, %c0_1] : memref<8x32xf32, #tpu.memory_space<vmem>>, vector<8x32xf32>
    %c0_2 = arith.constant 0 : index
    %c0_3 = arith.constant 0 : index
    %c0_4 = arith.constant 0 : index
    %4 = vector.load %arg7[%c0_2, %c0_3, %c0_4] : memref<1x1x32xf32, #tpu.memory_space<vmem>>, vector<1x1x32xf32>
    %5 = vector.shape_cast %4 : vector<1x1x32xf32> to vector<1x32xf32>
    %c0_5 = arith.constant 0 : index
    %c0_6 = arith.constant 0 : index
    %c0_7 = arith.constant 0 : index
    %6 = vector.load %arg8[%c0_5, %c0_6, %c0_7] : memref<1x1x32xf32, #tpu.memory_space<vmem>>, vector<1x1x32xf32>
    %7 = vector.shape_cast %6 : vector<1x1x32xf32> to vector<1x32xf32>
    %cst = arith.constant dense<0.000000e+00> : vector<8xf32>
    %8 = vector.multi_reduction <add>, %3, %cst [1] : vector<8x32xf32> to vector<8xf32>
    %9 = vector.shape_cast %8 : vector<8xf32> to vector<8x1xf32>
    %cst_8 = arith.constant 3.200000e+01 : f32
    %10 = vector.broadcast %cst_8 : f32 to vector<8x1xf32>
    %11 = arith.divf %9, %10 : vector<8x1xf32>
    %12 = vector.broadcast %11 : vector<8x1xf32> to vector<8x32xf32>
    %13 = arith.subf %3, %12 : vector<8x32xf32>
    %14 = arith.mulf %13, %13 : vector<8x32xf32>
    %cst_9 = arith.constant dense<0.000000e+00> : vector<8xf32>
    %15 = vector.multi_reduction <add>, %14, %cst_9 [1] : vector<8x32xf32> to vector<8xf32>
    %16 = vector.shape_cast %15 : vector<8xf32> to vector<8x1xf32>
    %cst_10 = arith.constant 3.200000e+01 : f32
    %17 = vector.broadcast %cst_10 : f32 to vector<8x1xf32>
    %18 = arith.divf %16, %17 : vector<8x1xf32>
    %19 = vector.broadcast %11 : vector<8x1xf32> to vector<8x32xf32>
    %20 = arith.subf %3, %19 : vector<8x32xf32>
    %cst_11 = arith.constant 9.99999974E-6 : f32
    %21 = vector.broadcast %cst_11 : f32 to vector<8x1xf32>
    %22 = arith.addf %18, %21 : vector<8x1xf32>
    %23 = math.rsqrt %22 : vector<8x1xf32>
    %24 = vector.broadcast %23 : vector<8x1xf32> to vector<8x32xf32>
    %25 = arith.mulf %20, %24 : vector<8x32xf32>
    %26 = vector.broadcast %5 : vector<1x32xf32> to vector<8x32xf32>
    %27 = arith.mulf %25, %26 : vector<8x32xf32>
    %28 = vector.broadcast %7 : vector<1x32xf32> to vector<8x32xf32>
    %29 = arith.addf %27, %28 : vector<8x32xf32>
    %c0_12 = arith.constant 0 : index
    %c0_13 = arith.constant 0 : index
    %c0_14 = arith.constant 0 : index
    %30 = vector.load %arg9[%c0_12, %c0_13, %c0_14] : memref<1x32x96xbf16, #tpu.memory_space<vmem>>, vector<1x32x96xbf16>
    %31 = vector.shape_cast %30 : vector<1x32x96xbf16> to vector<32x96xbf16>
    %32 = arith.truncf %29 : vector<8x32xf32> to vector<8x32xbf16>
    %cst_15 = arith.constant dense<0.000000e+00> : vector<8x96xf32>
    %33 = tpu.matmul %32, %31, %cst_15 {dimension_numbers = #tpu.dot_dimension_numbers<[1], [0], [0], [1], [0, 0, 1, 1], [], []>} : vector<8x32xbf16>, vector<32x96xbf16>, vector<8x96xf32> -> vector<8x96xf32>
    %c0_16 = arith.constant 0 : index
    %c0_17 = arith.constant 0 : index
    %c0_18 = arith.constant 0 : index
    %34 = vector.load %arg10[%c0_16, %c0_17, %c0_18] : memref<1x1x96xf32, #tpu.memory_space<vmem>>, vector<1x1x96xf32>
    %35 = vector.shape_cast %34 : vector<1x1x96xf32> to vector<1x96xf32>
    %36 = vector.broadcast %35 : vector<1x96xf32> to vector<8x96xf32>
    %37 = arith.addf %33, %36 : vector<8x96xf32>
    %38 = vector.extract_strided_slice %37 {offsets = [0, 0], sizes = [8, 8], strides = [1, 1]} : vector<8x96xf32> to vector<8x8xf32>
    %39 = arith.truncf %38 : vector<8x8xf32> to vector<8x8xbf16>
    %40 = vector.extract_strided_slice %37 {offsets = [0, 32], sizes = [8, 8], strides = [1, 1]} : vector<8x96xf32> to vector<8x8xf32>
    %41 = arith.truncf %40 : vector<8x8xf32> to vector<8x8xbf16>
    %42 = vector.extract_strided_slice %37 {offsets = [0, 64], sizes = [8, 8], strides = [1, 1]} : vector<8x96xf32> to vector<8x8xf32>
    %43 = arith.truncf %42 : vector<8x8xf32> to vector<8x8xbf16>
    %cst_19 = arith.constant dense<0.000000e+00> : vector<8x8xf32>
    %44 = tpu.matmul %39, %41, %cst_19 {dimension_numbers = #tpu.dot_dimension_numbers<[1], [1], [0], [0], [0, 0, 1, 0], [], []>} : vector<8x8xbf16>, vector<8x8xbf16>, vector<8x8xf32> -> vector<8x8xf32>
    %cst_20 = arith.constant 0.353553385 : f32
    %45 = vector.broadcast %cst_20 : f32 to vector<8x8xf32>
    %46 = arith.mulf %44, %45 : vector<8x8xf32>
    %cst_21 = arith.constant dense<0xFF800000> : vector<8xf32>
    %47 = vector.multi_reduction <maximumf>, %46, %cst_21 [1] : vector<8x8xf32> to vector<8xf32>
    %48 = vector.shape_cast %47 : vector<8xf32> to vector<8x1xf32>
    %49 = vector.broadcast %48 : vector<8x1xf32> to vector<8x8xf32>
    %50 = arith.subf %46, %49 : vector<8x8xf32>
    %51 = math.exp %50 : vector<8x8xf32>
    %cst_22 = arith.constant dense<0.000000e+00> : vector<8xf32>
    %52 = vector.multi_reduction <add>, %51, %cst_22 [1] : vector<8x8xf32> to vector<8xf32>
    %53 = vector.shape_cast %52 : vector<8xf32> to vector<8x1xf32>
    %54 = tpu.reciprocal %53 {approx = true} : vector<8x1xf32> -> vector<8x1xf32>
    %55 = arith.truncf %51 : vector<8x8xf32> to vector<8x8xbf16>
    %cst_23 = arith.constant dense<0.000000e+00> : vector<8x8xf32>
    %56 = tpu.matmul %55, %43, %cst_23 {dimension_numbers = #tpu.dot_dimension_numbers<[1], [0], [0], [1], [0, 0, 1, 1], [], []>} : vector<8x8xbf16>, vector<8x8xbf16>, vector<8x8xf32> -> vector<8x8xf32>
    %57 = vector.broadcast %54 : vector<8x1xf32> to vector<8x8xf32>
    %58 = arith.mulf %56, %57 : vector<8x8xf32>
    %c0_24 = arith.constant 0 : index
    %c0_25 = arith.constant 0 : index
    %59 = vector.load %arg24[%c0_24, %c0_25] : memref<8x32xf32, #tpu.memory_space<vmem>>, vector<8x8xf32>
    tpu.vector_store %arg24[%c0_24, %c0_25], %58 {strides = array<i32>} : memref<8x32xf32, #tpu.memory_space<vmem>>, vector<8x8xf32>,
    %60 = vector.extract_strided_slice %37 {offsets = [0, 8], sizes = [8, 8], strides = [1, 1]} : vector<8x96xf32> to vector<8x8xf32>
    %61 = arith.truncf %60 : vector<8x8xf32> to vector<8x8xbf16>
    %62 = vector.extract_strided_slice %37 {offsets = [0, 40], sizes = [8, 8], strides = [1, 1]} : vector<8x96xf32> to vector<8x8xf32>
    %63 = arith.truncf %62 : vector<8x8xf32> to vector<8x8xbf16>
    %64 = vector.extract_strided_slice %37 {offsets = [0, 72], sizes = [8, 8], strides = [1, 1]} : vector<8x96xf32> to vector<8x8xf32>
    %65 = arith.truncf %64 : vector<8x8xf32> to vector<8x8xbf16>
    %cst_26 = arith.constant dense<0.000000e+00> : vector<8x8xf32>
    %66 = tpu.matmul %61, %63, %cst_26 {dimension_numbers = #tpu.dot_dimension_numbers<[1], [1], [0], [0], [0, 0, 1, 0], [], []>} : vector<8x8xbf16>, vector<8x8xbf16>, vector<8x8xf32> -> vector<8x8xf32>
    %cst_27 = arith.constant 0.353553385 : f32
    %67 = vector.broadcast %cst_27 : f32 to vector<8x8xf32>
    %68 = arith.mulf %66, %67 : vector<8x8xf32>
    %cst_28 = arith.constant dense<0xFF800000> : vector<8xf32>
    %69 = vector.multi_reduction <maximumf>, %68, %cst_28 [1] : vector<8x8xf32> to vector<8xf32>
    %70 = vector.shape_cast %69 : vector<8xf32> to vector<8x1xf32>
    %71 = vector.broadcast %70 : vector<8x1xf32> to vector<8x8xf32>
    %72 = arith.subf %68, %71 : vector<8x8xf32>
    %73 = math.exp %72 : vector<8x8xf32>
    %cst_29 = arith.constant dense<0.000000e+00> : vector<8xf32>
    %74 = vector.multi_reduction <add>, %73, %cst_29 [1] : vector<8x8xf32> to vector<8xf32>
    %75 = vector.shape_cast %74 : vector<8xf32> to vector<8x1xf32>
    %76 = tpu.reciprocal %75 {approx = true} : vector<8x1xf32> -> vector<8x1xf32>
    %77 = arith.truncf %73 : vector<8x8xf32> to vector<8x8xbf16>
    %cst_30 = arith.constant dense<0.000000e+00> : vector<8x8xf32>
    %78 = tpu.matmul %77, %65, %cst_30 {dimension_numbers = #tpu.dot_dimension_numbers<[1], [0], [0], [1], [0, 0, 1, 1], [], []>} : vector<8x8xbf16>, vector<8x8xbf16>, vector<8x8xf32> -> vector<8x8xf32>
    %79 = vector.broadcast %76 : vector<8x1xf32> to vector<8x8xf32>
    %80 = arith.mulf %78, %79 : vector<8x8xf32>
    %c0_31 = arith.constant 0 : index
    %c8 = arith.constant 8 : index
    %81 = vector.load %arg24[%c0_31, %c8] : memref<8x32xf32, #tpu.memory_space<vmem>>, vector<8x8xf32>
    tpu.vector_store %arg24[%c0_31, %c8], %80 {strides = array<i32>} : memref<8x32xf32, #tpu.memory_space<vmem>>, vector<8x8xf32>,
    %82 = vector.extract_strided_slice %37 {offsets = [0, 16], sizes = [8, 8], strides = [1, 1]} : vector<8x96xf32> to vector<8x8xf32>
    %83 = arith.truncf %82 : vector<8x8xf32> to vector<8x8xbf16>
    %84 = vector.extract_strided_slice %37 {offsets = [0, 48], sizes = [8, 8], strides = [1, 1]} : vector<8x96xf32> to vector<8x8xf32>
    %85 = arith.truncf %84 : vector<8x8xf32> to vector<8x8xbf16>
    %86 = vector.extract_strided_slice %37 {offsets = [0, 80], sizes = [8, 8], strides = [1, 1]} : vector<8x96xf32> to vector<8x8xf32>
    %87 = arith.truncf %86 : vector<8x8xf32> to vector<8x8xbf16>
    %cst_32 = arith.constant dense<0.000000e+00> : vector<8x8xf32>
    %88 = tpu.matmul %83, %85, %cst_32 {dimension_numbers = #tpu.dot_dimension_numbers<[1], [1], [0], [0], [0, 0, 1, 0], [], []>} : vector<8x8xbf16>, vector<8x8xbf16>, vector<8x8xf32> -> vector<8x8xf32>
    %cst_33 = arith.constant 0.353553385 : f32
    %89 = vector.broadcast %cst_33 : f32 to vector<8x8xf32>
    %90 = arith.mulf %88, %89 : vector<8x8xf32>
    %cst_34 = arith.constant dense<0xFF800000> : vector<8xf32>
    %91 = vector.multi_reduction <maximumf>, %90, %cst_34 [1] : vector<8x8xf32> to vector<8xf32>
    %92 = vector.shape_cast %91 : vector<8xf32> to vector<8x1xf32>
    %93 = vector.broadcast %92 : vector<8x1xf32> to vector<8x8xf32>
    %94 = arith.subf %90, %93 : vector<8x8xf32>
    %95 = math.exp %94 : vector<8x8xf32>
    %cst_35 = arith.constant dense<0.000000e+00> : vector<8xf32>
    %96 = vector.multi_reduction <add>, %95, %cst_35 [1] : vector<8x8xf32> to vector<8xf32>
    %97 = vector.shape_cast %96 : vector<8xf32> to vector<8x1xf32>
    %98 = tpu.reciprocal %97 {approx = true} : vector<8x1xf32> -> vector<8x1xf32>
    %99 = arith.truncf %95 : vector<8x8xf32> to vector<8x8xbf16>
    %cst_36 = arith.constant dense<0.000000e+00> : vector<8x8xf32>
    %100 = tpu.matmul %99, %87, %cst_36 {dimension_numbers = #tpu.dot_dimension_numbers<[1], [0], [0], [1], [0, 0, 1, 1], [], []>} : vector<8x8xbf16>, vector<8x8xbf16>, vector<8x8xf32> -> vector<8x8xf32>
    %101 = vector.broadcast %98 : vector<8x1xf32> to vector<8x8xf32>
    %102 = arith.mulf %100, %101 : vector<8x8xf32>
    %c0_37 = arith.constant 0 : index
    %c16 = arith.constant 16 : index
    %103 = vector.load %arg24[%c0_37, %c16] : memref<8x32xf32, #tpu.memory_space<vmem>>, vector<8x8xf32>
    tpu.vector_store %arg24[%c0_37, %c16], %102 {strides = array<i32>} : memref<8x32xf32, #tpu.memory_space<vmem>>, vector<8x8xf32>,
    %104 = vector.extract_strided_slice %37 {offsets = [0, 24], sizes = [8, 8], strides = [1, 1]} : vector<8x96xf32> to vector<8x8xf32>
    %105 = arith.truncf %104 : vector<8x8xf32> to vector<8x8xbf16>
    %106 = vector.extract_strided_slice %37 {offsets = [0, 56], sizes = [8, 8], strides = [1, 1]} : vector<8x96xf32> to vector<8x8xf32>
    %107 = arith.truncf %106 : vector<8x8xf32> to vector<8x8xbf16>
    %108 = vector.extract_strided_slice %37 {offsets = [0, 88], sizes = [8, 8], strides = [1, 1]} : vector<8x96xf32> to vector<8x8xf32>
    %109 = arith.truncf %108 : vector<8x8xf32> to vector<8x8xbf16>
    %cst_38 = arith.constant dense<0.000000e+00> : vector<8x8xf32>
    %110 = tpu.matmul %105, %107, %cst_38 {dimension_numbers = #tpu.dot_dimension_numbers<[1], [1], [0], [0], [0, 0, 1, 0], [], []>} : vector<8x8xbf16>, vector<8x8xbf16>, vector<8x8xf32> -> vector<8x8xf32>
    %cst_39 = arith.constant 0.353553385 : f32
    %111 = vector.broadcast %cst_39 : f32 to vector<8x8xf32>
    %112 = arith.mulf %110, %111 : vector<8x8xf32>
    %cst_40 = arith.constant dense<0xFF800000> : vector<8xf32>
    %113 = vector.multi_reduction <maximumf>, %112, %cst_40 [1] : vector<8x8xf32> to vector<8xf32>
    %114 = vector.shape_cast %113 : vector<8xf32> to vector<8x1xf32>
    %115 = vector.broadcast %114 : vector<8x1xf32> to vector<8x8xf32>
    %116 = arith.subf %112, %115 : vector<8x8xf32>
    %117 = math.exp %116 : vector<8x8xf32>
    %cst_41 = arith.constant dense<0.000000e+00> : vector<8xf32>
    %118 = vector.multi_reduction <add>, %117, %cst_41 [1] : vector<8x8xf32> to vector<8xf32>
    %119 = vector.shape_cast %118 : vector<8xf32> to vector<8x1xf32>
    %120 = tpu.reciprocal %119 {approx = true} : vector<8x1xf32> -> vector<8x1xf32>
    %121 = arith.truncf %117 : vector<8x8xf32> to vector<8x8xbf16>
    %cst_42 = arith.constant dense<0.000000e+00> : vector<8x8xf32>
    %122 = tpu.matmul %121, %109, %cst_42 {dimension_numbers = #tpu.dot_dimension_numbers<[1], [0], [0], [1], [0, 0, 1, 1], [], []>} : vector<8x8xbf16>, vector<8x8xbf16>, vector<8x8xf32> -> vector<8x8xf32>
    %123 = vector.broadcast %120 : vector<8x1xf32> to vector<8x8xf32>
    %124 = arith.mulf %122, %123 : vector<8x8xf32>
    %c0_43 = arith.constant 0 : index
    %c24 = arith.constant 24 : index
    %125 = vector.load %arg24[%c0_43, %c24] : memref<8x32xf32, #tpu.memory_space<vmem>>, vector<8x8xf32>
    tpu.vector_store %arg24[%c0_43, %c24], %124 {strides = array<i32>} : memref<8x32xf32, #tpu.memory_space<vmem>>, vector<8x8xf32>,
    %c0_44 = arith.constant 0 : index
    %c0_45 = arith.constant 0 : index
    %126 = vector.load %arg24[%c0_44, %c0_45] : memref<8x32xf32, #tpu.memory_space<vmem>>, vector<8x32xf32>
    %c0_46 = arith.constant 0 : index
    %c0_47 = arith.constant 0 : index
    %c0_48 = arith.constant 0 : index
    %127 = vector.load %arg11[%c0_46, %c0_47, %c0_48] : memref<1x32x32xbf16, #tpu.memory_space<vmem>>, vector<1x32x32xbf16>
    %128 = vector.shape_cast %127 : vector<1x32x32xbf16> to vector<32x32xbf16>
    %129 = arith.truncf %126 : vector<8x32xf32> to vector<8x32xbf16>
    %cst_49 = arith.constant dense<0.000000e+00> : vector<8x32xf32>
    %130 = tpu.matmul %129, %128, %cst_49 {dimension_numbers = #tpu.dot_dimension_numbers<[1], [0], [0], [1], [0, 0, 1, 1], [], []>} : vector<8x32xbf16>, vector<32x32xbf16>, vector<8x32xf32> -> vector<8x32xf32>
    %131 = arith.addf %3, %130 : vector<8x32xf32>
    %c0_50 = arith.constant 0 : index
    %c0_51 = arith.constant 0 : index
    %c0_52 = arith.constant 0 : index
    %132 = vector.load %arg12[%c0_50, %c0_51, %c0_52] : memref<1x1x32xf32, #tpu.memory_space<vmem>>, vector<1x1x32xf32>
    %133 = vector.shape_cast %132 : vector<1x1x32xf32> to vector<1x32xf32>
    %134 = vector.broadcast %133 : vector<1x32xf32> to vector<8x32xf32>
    %135 = arith.addf %131, %134 : vector<8x32xf32>
    %c0_53 = arith.constant 0 : index
    %c0_54 = arith.constant 0 : index
    %c0_55 = arith.constant 0 : index
    %136 = vector.load %arg13[%c0_53, %c0_54, %c0_55] : memref<1x1x32xf32, #tpu.memory_space<vmem>>, vector<1x1x32xf32>
    %137 = vector.shape_cast %136 : vector<1x1x32xf32> to vector<1x32xf32>
    %c0_56 = arith.constant 0 : index
    %c0_57 = arith.constant 0 : index
    %c0_58 = arith.constant 0 : index
    %138 = vector.load %arg14[%c0_56, %c0_57, %c0_58] : memref<1x1x32xf32, #tpu.memory_space<vmem>>, vector<1x1x32xf32>
    %139 = vector.shape_cast %138 : vector<1x1x32xf32> to vector<1x32xf32>
    %cst_59 = arith.constant dense<0.000000e+00> : vector<8xf32>
    %140 = vector.multi_reduction <add>, %135, %cst_59 [1] : vector<8x32xf32> to vector<8xf32>
    %141 = vector.shape_cast %140 : vector<8xf32> to vector<8x1xf32>
    %cst_60 = arith.constant 3.200000e+01 : f32
    %142 = vector.broadcast %cst_60 : f32 to vector<8x1xf32>
    %143 = arith.divf %141, %142 : vector<8x1xf32>
    %144 = vector.broadcast %143 : vector<8x1xf32> to vector<8x32xf32>
    %145 = arith.subf %135, %144 : vector<8x32xf32>
    %146 = arith.mulf %145, %145 : vector<8x32xf32>
    %cst_61 = arith.constant dense<0.000000e+00> : vector<8xf32>
    %147 = vector.multi_reduction <add>, %146, %cst_61 [1] : vector<8x32xf32> to vector<8xf32>
    %148 = vector.shape_cast %147 : vector<8xf32> to vector<8x1xf32>
    %cst_62 = arith.constant 3.200000e+01 : f32
    %149 = vector.broadcast %cst_62 : f32 to vector<8x1xf32>
    %150 = arith.divf %148, %149 : vector<8x1xf32>
    %151 = vector.broadcast %143 : vector<8x1xf32> to vector<8x32xf32>
    %152 = arith.subf %135, %151 : vector<8x32xf32>
    %cst_63 = arith.constant 9.99999974E-6 : f32
    %153 = vector.broadcast %cst_63 : f32 to vector<8x1xf32>
    %154 = arith.addf %150, %153 : vector<8x1xf32>
    %155 = math.rsqrt %154 : vector<8x1xf32>
    %156 = vector.broadcast %155 : vector<8x1xf32> to vector<8x32xf32>
    %157 = arith.mulf %152, %156 : vector<8x32xf32>
    %158 = vector.broadcast %137 : vector<1x32xf32> to vector<8x32xf32>
    %159 = arith.mulf %157, %158 : vector<8x32xf32>
    %160 = vector.broadcast %139 : vector<1x32xf32> to vector<8x32xf32>
    %161 = arith.addf %159, %160 : vector<8x32xf32>
    %c0_64 = arith.constant 0 : index
    %c0_65 = arith.constant 0 : index
    %c0_66 = arith.constant 0 : index
    %162 = vector.load %arg15[%c0_64, %c0_65, %c0_66] : memref<1x32x128xbf16, #tpu.memory_space<vmem>>, vector<1x32x128xbf16>
    %163 = vector.shape_cast %162 : vector<1x32x128xbf16> to vector<32x128xbf16>
    %164 = arith.truncf %161 : vector<8x32xf32> to vector<8x32xbf16>
    %cst_67 = arith.constant dense<0.000000e+00> : vector<8x128xf32>
    %165 = tpu.matmul %164, %163, %cst_67 {dimension_numbers = #tpu.dot_dimension_numbers<[1], [0], [0], [1], [0, 0, 1, 1], [], []>} : vector<8x32xbf16>, vector<32x128xbf16>, vector<8x128xf32> -> vector<8x128xf32>
    %c0_68 = arith.constant 0 : index
    %c0_69 = arith.constant 0 : index
    %c0_70 = arith.constant 0 : index
    %166 = vector.load %arg16[%c0_68, %c0_69, %c0_70] : memref<1x1x128xf32, #tpu.memory_space<vmem>>, vector<1x1x128xf32>
    %167 = vector.shape_cast %166 : vector<1x1x128xf32> to vector<1x128xf32>
    %168 = vector.broadcast %167 : vector<1x128xf32> to vector<8x128xf32>
    %169 = arith.addf %165, %168 : vector<8x128xf32>
    %cst_71 = arith.constant 5.000000e-01 : f32
    %170 = vector.broadcast %cst_71 : f32 to vector<8x128xf32>
    %171 = arith.mulf %170, %169 : vector<8x128xf32>
    %cst_72 = arith.constant 4.471500e-02 : f32
    %172 = vector.broadcast %cst_72 : f32 to vector<8x128xf32>
    %173 = arith.mulf %172, %169 : vector<8x128xf32>
    %174 = arith.mulf %173, %169 : vector<8x128xf32>
    %175 = arith.mulf %174, %169 : vector<8x128xf32>
    %176 = arith.addf %169, %175 : vector<8x128xf32>
    %cst_73 = arith.constant 0.797884583 : f32
    %177 = vector.broadcast %cst_73 : f32 to vector<8x128xf32>
    %178 = arith.mulf %177, %176 : vector<8x128xf32>
    %179 = math.tanh %178 : vector<8x128xf32>
    %cst_74 = arith.constant 1.000000e+00 : f32
    %180 = vector.broadcast %cst_74 : f32 to vector<8x128xf32>
    %181 = arith.addf %180, %179 : vector<8x128xf32>
    %182 = arith.mulf %171, %181 : vector<8x128xf32>
    %c0_75 = arith.constant 0 : index
    %c0_76 = arith.constant 0 : index
    %c0_77 = arith.constant 0 : index
    %183 = vector.load %arg17[%c0_75, %c0_76, %c0_77] : memref<1x128x32xbf16, #tpu.memory_space<vmem>>, vector<1x128x32xbf16>
    %184 = vector.shape_cast %183 : vector<1x128x32xbf16> to vector<128x32xbf16>
    %185 = arith.truncf %182 : vector<8x128xf32> to vector<8x128xbf16>
    %cst_78 = arith.constant dense<0.000000e+00> : vector<8x32xf32>
    %186 = tpu.matmul %185, %184, %cst_78 {dimension_numbers = #tpu.dot_dimension_numbers<[1], [0], [0], [1], [0, 0, 1, 1], [], []>} : vector<8x128xbf16>, vector<128x32xbf16>, vector<8x32xf32> -> vector<8x32xf32>
    %187 = arith.addf %135, %186 : vector<8x32xf32>
    %c0_79 = arith.constant 0 : index
    %c0_80 = arith.constant 0 : index
    %c0_81 = arith.constant 0 : index
    %188 = vector.load %arg18[%c0_79, %c0_80, %c0_81] : memref<1x1x32xf32, #tpu.memory_space<vmem>>, vector<1x1x32xf32>
    %189 = vector.shape_cast %188 : vector<1x1x32xf32> to vector<1x32xf32>
    %190 = vector.broadcast %189 : vector<1x32xf32> to vector<8x32xf32>
    %191 = arith.addf %187, %190 : vector<8x32xf32>
    %c0_82 = arith.constant 0 : index
    %c0_83 = arith.constant 0 : index
    %192 = vector.load %arg23[%c0_82, %c0_83] : memref<8x32xf32, #tpu.memory_space<vmem>>, vector<8x32xf32>
    tpu.vector_store %arg23[%c0_82, %c0_83], %191 {strides = array<i32>} : memref<8x32xf32, #tpu.memory_space<vmem>>, vector<8x32xf32>,
    %c1_i32 = arith.constant 1 : i32
    %193 = arith.cmpi eq, %arg1, %c1_i32 : i32
    %194 = arith.extui %193 : i1 to i32
    %c0_i32_84 = arith.constant 0 : i32
    %195 = arith.cmpi ne, %194, %c0_i32_84 : i32
    scf.if %195 {
      %c0_85 = arith.constant 0 : index
      %c0_86 = arith.constant 0 : index
      %196 = vector.load %arg19[%c0_85, %c0_86] : memref<1x32xf32, #tpu.memory_space<vmem>>, vector<1x32xf32>
      %c0_87 = arith.constant 0 : index
      %c0_88 = arith.constant 0 : index
      %197 = vector.load %arg20[%c0_87, %c0_88] : memref<1x32xf32, #tpu.memory_space<vmem>>, vector<1x32xf32>
      %cst_89 = arith.constant dense<0.000000e+00> : vector<8xf32>
      %198 = vector.multi_reduction <add>, %191, %cst_89 [1] : vector<8x32xf32> to vector<8xf32>
      %199 = vector.shape_cast %198 : vector<8xf32> to vector<8x1xf32>
      %cst_90 = arith.constant 3.200000e+01 : f32
      %200 = vector.broadcast %cst_90 : f32 to vector<8x1xf32>
      %201 = arith.divf %199, %200 : vector<8x1xf32>
      %202 = vector.broadcast %201 : vector<8x1xf32> to vector<8x32xf32>
      %203 = arith.subf %191, %202 : vector<8x32xf32>
      %204 = arith.mulf %203, %203 : vector<8x32xf32>
      %cst_91 = arith.constant dense<0.000000e+00> : vector<8xf32>
      %205 = vector.multi_reduction <add>, %204, %cst_91 [1] : vector<8x32xf32> to vector<8xf32>
      %206 = vector.shape_cast %205 : vector<8xf32> to vector<8x1xf32>
      %cst_92 = arith.constant 3.200000e+01 : f32
      %207 = vector.broadcast %cst_92 : f32 to vector<8x1xf32>
      %208 = arith.divf %206, %207 : vector<8x1xf32>
      %209 = vector.broadcast %201 : vector<8x1xf32> to vector<8x32xf32>
      %210 = arith.subf %191, %209 : vector<8x32xf32>
      %cst_93 = arith.constant 9.99999974E-6 : f32
      %211 = vector.broadcast %cst_93 : f32 to vector<8x1xf32>
      %212 = arith.addf %208, %211 : vector<8x1xf32>
      %213 = math.rsqrt %212 : vector<8x1xf32>
      %214 = vector.broadcast %213 : vector<8x1xf32> to vector<8x32xf32>
      %215 = arith.mulf %210, %214 : vector<8x32xf32>
      %216 = vector.broadcast %196 : vector<1x32xf32> to vector<8x32xf32>
      %217 = arith.mulf %215, %216 : vector<8x32xf32>
      %218 = vector.broadcast %197 : vector<1x32xf32> to vector<8x32xf32>
      %219 = arith.addf %217, %218 : vector<8x32xf32>
      %c0_94 = arith.constant 0 : index
      %c0_95 = arith.constant 0 : index
      %220 = vector.load %arg21[%c0_94, %c0_95] : memref<32x128xbf16, #tpu.memory_space<vmem>>, vector<32x128xbf16>
      %221 = arith.truncf %219 : vector<8x32xf32> to vector<8x32xbf16>
      %cst_96 = arith.constant dense<0.000000e+00> : vector<8x128xf32>
      %222 = tpu.matmul %221, %220, %cst_96 {dimension_numbers = #tpu.dot_dimension_numbers<[1], [0], [0], [1], [0, 0, 1, 1], [], []>} : vector<8x32xbf16>, vector<32x128xbf16>, vector<8x128xf32> -> vector<8x128xf32>
      %c0_97 = arith.constant 0 : index
      %c0_98 = arith.constant 0 : index
      %c0_99 = arith.constant 0 : index
      %223 = vector.load %arg22[%c0_97, %c0_98, %c0_99] : memref<1x8x128xf32, #tpu.memory_space<vmem>>, vector<1x8x128xf32>
      %224 = vector.shape_cast %223 : vector<1x8x128xf32> to vector<8x128xf32>
      %225 = vector.shape_cast %222 : vector<8x128xf32> to vector<1x8x128xf32>
      tpu.vector_store %arg22[%c0_97, %c0_98, %c0_99], %225 {strides = array<i32>} : memref<1x8x128xf32, #tpu.memory_space<vmem>>, vector<1x8x128xf32>,
    } else {
    }
    return
  }
  func.func @transform_0(%arg0: i32, %arg1: i32) -> (i32, i32, i32) {
    %c0_i32 = arith.constant 0 : i32
    %c0_i32_0 = arith.constant 0 : i32
    %c0_i32_1 = arith.constant 0 : i32
    return %arg0, %c0_i32, %c0_i32_0 : i32, i32, i32
  }
  func.func @transform_1(%arg0: i32, %arg1: i32) -> (i32, i32) {
    %c0_i32 = arith.constant 0 : i32
    %c0_i32_0 = arith.constant 0 : i32
    %c0_i32_1 = arith.constant 0 : i32
    return %c0_i32, %c0_i32_0 : i32, i32
  }
  func.func @transform_2(%arg0: i32, %arg1: i32) -> (i32, i32) {
    %c0_i32 = arith.constant 0 : i32
    %c0_i32_0 = arith.constant 0 : i32
    %c0_i32_1 = arith.constant 0 : i32
    return %c0_i32, %c0_i32_0 : i32, i32
  }
  func.func @transform_3(%arg0: i32, %arg1: i32) -> (i32, i32) {
    %c0_i32 = arith.constant 0 : i32
    %c0_i32_0 = arith.constant 0 : i32
    %c0_i32_1 = arith.constant 0 : i32
    return %c0_i32, %c0_i32_0 : i32, i32
  }
  func.func @transform_4(%arg0: i32, %arg1: i32) -> (i32, i32) {
    %c0_i32 = arith.constant 0 : i32
    %c0_i32_0 = arith.constant 0 : i32
    %c0_i32_1 = arith.constant 0 : i32
    return %c0_i32, %c0_i32_0 : i32, i32
  }
  func.func @transform_5(%arg0: i32, %arg1: i32) -> (i32, i32, i32) {
    %c0_i32 = arith.constant 0 : i32
    %c0_i32_0 = arith.constant 0 : i32
    %c0_i32_1 = arith.constant 0 : i32
    return %arg1, %c0_i32, %c0_i32_0 : i32, i32, i32
  }
  func.func @transform_6(%arg0: i32, %arg1: i32) -> (i32, i32, i32) {
    %c0_i32 = arith.constant 0 : i32
    %c0_i32_0 = arith.constant 0 : i32
    %c0_i32_1 = arith.constant 0 : i32
    return %arg1, %c0_i32, %c0_i32_0 : i32, i32, i32
  }
  func.func @transform_7(%arg0: i32, %arg1: i32) -> (i32, i32, i32) {
    %c0_i32 = arith.constant 0 : i32
    %c0_i32_0 = arith.constant 0 : i32
    %c0_i32_1 = arith.constant 0 : i32
    return %arg1, %c0_i32, %c0_i32_0 : i32, i32, i32
  }
  func.func @transform_8(%arg0: i32, %arg1: i32) -> (i32, i32, i32) {
    %c0_i32 = arith.constant 0 : i32
    %c0_i32_0 = arith.constant 0 : i32
    %c0_i32_1 = arith.constant 0 : i32
    return %arg1, %c0_i32, %c0_i32_0 : i32, i32, i32
  }
  func.func @transform_9(%arg0: i32, %arg1: i32) -> (i32, i32, i32) {
    %c0_i32 = arith.constant 0 : i32
    %c0_i32_0 = arith.constant 0 : i32
    %c0_i32_1 = arith.constant 0 : i32
    return %arg1, %c0_i32, %c0_i32_0 : i32, i32, i32
  }
  func.func @transform_10(%arg0: i32, %arg1: i32) -> (i32, i32, i32) {
    %c0_i32 = arith.constant 0 : i32
    %c0_i32_0 = arith.constant 0 : i32
    %c0_i32_1 = arith.constant 0 : i32
    return %arg1, %c0_i32, %c0_i32_0 : i32, i32, i32
  }
  func.func @transform_11(%arg0: i32, %arg1: i32) -> (i32, i32, i32) {
    %c0_i32 = arith.constant 0 : i32
    %c0_i32_0 = arith.constant 0 : i32
    %c0_i32_1 = arith.constant 0 : i32
    return %arg1, %c0_i32, %c0_i32_0 : i32, i32, i32
  }
  func.func @transform_12(%arg0: i32, %arg1: i32) -> (i32, i32, i32) {
    %c0_i32 = arith.constant 0 : i32
    %c0_i32_0 = arith.constant 0 : i32
    %c0_i32_1 = arith.constant 0 : i32
    return %arg1, %c0_i32, %c0_i32_0 : i32, i32, i32
  }
  func.func @transform_13(%arg0: i32, %arg1: i32) -> (i32, i32, i32) {
    %c0_i32 = arith.constant 0 : i32
    %c0_i32_0 = arith.constant 0 : i32
    %c0_i32_1 = arith.constant 0 : i32
    return %arg1, %c0_i32, %c0_i32_0 : i32, i32, i32
  }
  func.func @transform_14(%arg0: i32, %arg1: i32) -> (i32, i32, i32) {
    %c0_i32 = arith.constant 0 : i32
    %c0_i32_0 = arith.constant 0 : i32
    %c0_i32_1 = arith.constant 0 : i32
    return %arg1, %c0_i32, %c0_i32_0 : i32, i32, i32
  }
  func.func @transform_15(%arg0: i32, %arg1: i32) -> (i32, i32, i32) {
    %c0_i32 = arith.constant 0 : i32
    %c0_i32_0 = arith.constant 0 : i32
    %c0_i32_1 = arith.constant 0 : i32
    return %arg1, %c0_i32, %c0_i32_0 : i32, i32, i32
  }
  func.func @transform_16(%arg0: i32, %arg1: i32) -> (i32, i32, i32) {
    %c0_i32 = arith.constant 0 : i32
    %c0_i32_0 = arith.constant 0 : i32
    %c0_i32_1 = arith.constant 0 : i32
    return %arg1, %c0_i32, %c0_i32_0 : i32, i32, i32
  }
  func.func @transform_17(%arg0: i32, %arg1: i32) -> (i32, i32) {
    %c0_i32 = arith.constant 0 : i32
    %c0_i32_0 = arith.constant 0 : i32
    %c0_i32_1 = arith.constant 0 : i32
    return %c0_i32, %c0_i32_0 : i32, i32
  }
  func.func @transform_18(%arg0: i32, %arg1: i32) -> (i32, i32) {
    %c0_i32 = arith.constant 0 : i32
    %c0_i32_0 = arith.constant 0 : i32
    %c0_i32_1 = arith.constant 0 : i32
    return %c0_i32, %c0_i32_0 : i32, i32
  }
  func.func @transform_19(%arg0: i32, %arg1: i32) -> (i32, i32) {
    %c0_i32 = arith.constant 0 : i32
    %c0_i32_0 = arith.constant 0 : i32
    %c0_i32_1 = arith.constant 0 : i32
    return %c0_i32, %c0_i32_0 : i32, i32
  }
  func.func @transform_20(%arg0: i32, %arg1: i32) -> (i32, i32, i32) {
    %c0_i32 = arith.constant 0 : i32
    %c0_i32_0 = arith.constant 0 : i32
    %c0_i32_1 = arith.constant 0 : i32
    return %arg0, %c0_i32, %c0_i32_0 : i32, i32, i32
  }
}

</mosaic_0001>

<bundles_post_ra>
// kernel: spec_vit_mean_forward.1
= control target key start
LH: loop header
LB: loop body
LE: loop exit
PB: predicated region body
PF: predicated region fallthrough
CT: control target
= control target key end

     0   :  { %s3517_s0 = inlined_call_operand.vmem [shape: bf16[2,8,512], index: 0, kind: input, shape index: {}]   ;;  %s3518_s1 = inlined_call_operand.vmem [shape: bf16[512,32], index: 1, kind: input, shape index: {}]   ;;  %s3519_s2 = inlined_call_operand.vmem [shape: f32[8,32], index: 2, kind: input, shape index: {}]   ;;  %s3520_s3 = inlined_call_operand.vmem [shape: f32[1,32], index: 3, kind: input, shape index: {}]   ;;  %s3521_s4 = inlined_call_operand.vmem [shape: f32[1,32], index: 4, kind: input, shape index: {}]   ;;  %s3522_s5 = inlined_call_operand.vmem [shape: f32[2,1,32], index: 5, kind: input, shape index: {}]   ;;  %s3523_s6 = inlined_call_operand.vmem [shape: f32[2,1,32], index: 6, kind: input, shape index: {}]   ;;  %s3524_s7 = inlined_call_operand.vmem [shape: bf16[2,32,96], index: 7, kind: input, shape index: {}]   ;;  %s3525_s8 = inlined_call_operand.vmem [shape: f32[2,1,96], index: 8, kind: input, shape index: {}]   ;;  %s3526_s9 = inlined_call_operand.vmem [shape: bf16[2,32,32], index: 9, kind: input, shape index: {}]   ;;  %s3527_s10 = inlined_call_operand.vmem [shape: f32[2,1,32], index: 10, kind: input, shape index: {}]   ;;  %s3528_s11 = inlined_call_operand.vmem [shape: f32[2,1,32], index: 11, kind: input, shape index: {}]   ;;  %s3529_s12 = inlined_call_operand.vmem [shape: f32[2,1,32], index: 12, kind: input, shape index: {}]   ;;  %s3530_s13 = inlined_call_operand.vmem [shape: bf16[2,32,128], index: 13, kind: input, shape index: {}]   ;;  %s3531_s14 = inlined_call_operand.vmem [shape: f32[2,1,128], index: 14, kind: input, shape index: {}]   ;;  %s3532_s15 = inlined_call_operand.vmem [shape: bf16[2,128,32], index: 15, kind: input, shape index: {}]   ;;  %s3533_s16 = inlined_call_operand.vmem [shape: f32[2,1,32], index: 16, kind: input, shape index: {}]   ;;  %s3534_s17 = inlined_call_operand.vmem [shape: f32[1,32], index: 17, kind: input, shape index: {}]   ;;  %s3535_s18 = inlined_call_operand.vmem [shape: f32[1,32], index: 18, kind: input, shape index: {}]   ;;  %s3536_s19 = inlined_call_operand.vmem [shape: bf16[32,128], index: 19, kind: input, shape index: {}]   ;;  %s3537_s20 = inlined_call_operand.hbm [shape: f32[2,8,128], index: 20, kind: output, shape index: {}]  }
   0x1   :  { %3555 = sst [smem:[#allocation20_spill]] %s3517_s0 }
   0x2   :  { %3556 = sst [smem:[#allocation21_spill]] %s3518_s1 }
   0x3   :  { %3557 = sst [smem:[#allocation22_spill]] %s3519_s2 }
   0x4   :  { %3558 = sst [smem:[#allocation23_spill]] %s3520_s3 }
   0x5   :  { %3559 = sst [smem:[#allocation24_spill]] %s3521_s4 }
   0x6   :  { %3560 = sst [smem:[#allocation25_spill]] %s3523_s6 }
   0x7   :  { %3561 = sst [smem:[#allocation26_spill]] %s3524_s7 }
   0x8   :  { %3562 = sst [smem:[#allocation27_spill]] %s3526_s9 }
   0x9   :  { %3563 = sst [smem:[#allocation28_spill]] %s3534_s17 }
   0xa   :  { %3564 = sst [smem:[#allocation29_spill]] %s3535_s18 }
   0xb   :  { %3565 = sst [smem:[#allocation30_spill]] %s3536_s19 }
   0xc   :  { %3566 = sst [smem:[#allocation31_spill]] %s3537_s20 }
   0xd   :  { %25 = vsyncpa [#allocation5], 0 }
   0xe   :  { %27 = vsyncpa [#allocation5 + $0x1], 0  ;;  %s3043_s1 = smov 0   ;;  %s3045_s22 = smov 0  }
   0xf   :  { %s3047_s23 = smov 0   ;;  %s3049_s24 = smov 0  }
  0x10   :  { %s3051_s2 = smov 0   ;;  %s3053_s25 = smov 0  }
  0x11   :  { %s3055_s3 = smov 0   ;;  %s3057_s26 = smov 0  }
  0x12 LB: > { %3567 = sst [smem:[#allocation7_spill]] %s2889_s1  ;;  %s2374_s27 = sadd.s32 4294967295, %s2917_s26   ;;  %s2917_s26 = sphi %s3057_s26, %s33_s26   ;;  %s2913_s3 = sphi %s3055_s3, %s3618_s3   ;;  %s2909_s25 = sphi %s3053_s25, %s3617_s25   ;;  %s2905_s2 = sphi %s3051_s2, %s3616_s2   ;;  %s2901_s24 = sphi %s3049_s24, %s3615_s24   ;;  %s2897_s23 = sphi %s3047_s23, %s3614_s23   ;;  %s2893_s22 = sphi %s3045_s22, %s3613_s22   ;;  %s2889_s1 = sphi %s3043_s1, %s3612_s1  }
  0x13   : > { %3568 = sst [smem:[#allocation8_spill]] %s2893_s22  ;;  %s2375_s28 = sadd.s32 4294967294, %s2917_s26  }
  0x14   : > { %3569 = sst [smem:[#allocation9_spill]] %s2897_s23  ;;  %s42_s4 = sadd.s32 1, %s2909_s25 }
  0x15   : > { %3570 = sst [smem:[#allocation10_spill]] %s2901_s24  ;;  %p43_p0 = scmp.ge.s32.totalorder %s42_s4, 2 }
  0x16   : > { %3571 = sst [smem:[#allocation11_spill]] %s2905_s2  ;;  %s45_s29 = sadd.s32 1, %s2913_s3 }
  0x17   : > { %3572 = sst [smem:[#allocation12_spill]] %s2909_s25  ;;  %p547_p1 = scmp.ne.s32.totalorder %s2897_s23, %s2893_s22 }
  0x18   : > { %3573 = sst [smem:[#allocation13_spill]] %s2913_s3  ;;  %p548_p2 = scmp.eq.s32.totalorder %s2374_s27, 3 }
  0x19   : > { %3574 = sst [smem:[#allocation14_spill]] %s2917_s26  ;;  %s3620_s4 = smov (%p43_p0, %s42_s4), 0 }
  0x1a   : > { %3575 = sst [smem:[#allocation15_spill]] %s3620_s4  ;;  %s3622_s29 = smov (!%p43_p0, %s45_s29), %s2913_s3 }
  0x1b   : > { %p3092_p3 = por %p548_p2, %p547_p1  ;;  %p553_p4 = scmp.ne.s32.totalorder %s2893_s22, %s2889_s1 }
  0x1c   : > { %p47_p5 = scmp.ge.s32.totalorder %s3622_s29, 2  ;;  %p554_p6 = scmp.eq.s32.totalorder %s2375_s28, 3 }
  0x1d   : > { %s3576_s30 = scalar_select %p3092_p3, 1, 0 }
  0x1e   : > { %p2378_p7 = scmp.ge.s32.totalorder %s2917_s26, 1  ;;  %p681_p8 = scmp.lt.s32.totalorder %s2917_s26, 5 }
  0x1f   : > { %3577 = sst [smem:[#allocation16_spill]] %s3576_s30  ;;  %s3624_s29 = smov (%p47_p5, %s3622_s29), 0 }
  0x20   : > { %3578 = sst [smem:[#allocation17_spill]] %s3624_s29  ;;  %p3102_p9 = por %p554_p6, %p553_p4 }
  0x21   : > { %p682_p10 = pnand %p2378_p7, %p681_p8  ;;  %s534_s21 = ssub.s32 %s2913_s3, %s3624_s29 }
  0x22   : > { %s3579_s0 = scalar_select %p3102_p9, 1, 0 }
  0x23   : > { %s537_s27 = sadd.s32 1, %s2897_s23  ;;  %p535_p11 = scmp.eq.s32.totalorder %s534_s21, 0 }
  0x24   : > { %3580 = sst [smem:[#allocation18_spill]] %s3579_s0  ;;  %685 = sbr.rel (%p682_p10) target bundleno = 3441 (0xd71), region = 100 }
  0x25   : > { %s3110_s4 = scalar_select %p535_p11, %s2897_s23, %s537_s27  }
  0x26   : > { %s3544_s28 = sand.u32 (!%p682_p10), 1, %s2893_s22   ;;  %p783_p12 = scmp.lt.s32.totalorder (!%p682_p10), %s2905_s2, 1 }
  0x27   : > { %3581 = sst [smem:[#allocation19_spill]] %s3110_s4  ;;  %s3116_s25 = sshll.u32 (!%p682_p10), %s3544_s28, 3 }
  0x28   : > { %p788_p13 = scmp.lt.s32.totalorder (!%p682_p10), %s2901_s24, 1  ;;  %s3582_s3 = sld [smem:[#allocation20_spill]] (!%p682_p10) }
  0x29   : > { %s784_s0 = scalar_select %p783_p12, %s2905_s2, 1 }
  0x2a   : > { %s3121_s1 = scalar_select %p788_p13, %s2901_s24, 1 }
  0x2b   : > { %s2472_s21 = sshll.u32 %s784_s0, 4  ;;  %s3584_s7 = sld [smem:[#allocation26_spill]] }
  0x2c   : > { %s2473_s2 = sshll.u32 %s3121_s1, 4  ;;  %s3585_s9 = sld [smem:[#allocation27_spill]] }
  0x2d   : > { %s3166_s0 = scalar_lea.vmem %s3530_s13, %s2473_s2  ;;  %s823_s29 = scalar_lea.vmem %s3531_s14, %s3121_s1 }
  0x2e   : > { %s3126_s28 = scalar_lea.vmem %s3582_s3, %s2472_s21  ;;  %s831_s20 = scalar_lea.vmem %s3533_s16, %s3121_s1 }
  0x2f   : > { %s782_s17 = scalar_lea.vmem [#allocation4], %s3116_s25  ;;  %s3586_s18 = sld [smem:[#allocation10_spill]] }
  0x31   : > { %s3140_s19 = scalar_lea.vmem %s3584_s7, %s2473_s2 }
  0x32   : > { %s3149_s27 = scalar_lea.vmem %s3585_s9, %s2473_s2  ;;  %s2476_s9 = sshll.u32 %s3121_s1, 6 }
  0x33   : > { %s3180_s26 = scalar_lea.vmem %s3532_s15, %s2476_s9 }
  0x35   : > { %p2390_p0 = scmp.ne.s32.totalorder %s3586_s18, 0 }
  0x36   : > { %s3587_s24 = sld [smem:[#allocation21_spill]] (!%p2390_p0) }
  0x37   : > { %836 = sbr.rel (%p2390_p0) target bundleno = 604 (0x25c), region = 104  ;;  %s3589_s2 = sld [smem:[#allocation22_spill]] (!%p2390_p0) }
  0x38   : > { %s3590_s3 = sld [smem:[#allocation23_spill]] (!%p2390_p0) }
  0x39   : > { %s3591_s4 = sld [smem:[#allocation24_spill]] (!%p2390_p0) }
  0x3c   : > { %s3588_s7 = smov %s3587_s24  ;;  %v2747_v0 = vld [vmem:[%s3587_s24 + $0x78] sm:$0xff]   ;;  %v837_v32 = vld [vmem:[%s3126_s28] sm:$0xff]  ;;  %v838_v33 = vld [vmem:[%s3126_s28 + $0x8] sm:$0xff]  ;;  %vm1192_vm0 = vcmask 261120  }
  0x3d   : > { %v2748_v1 = vld [vmem:[%s3588_s7 + $0xf8] sm:$0xff]   ;;  %2477 = vmatprep.subr.bf16.mxu0 %v2747_v0  ;;  %v2751_v4 = vld [vmem:[%s3588_s7 + $0x70] sm:$0xff]   ;;  %v2755_v8 = vld [vmem:[%s3588_s7 + $0x68] sm:$0xff]   ;;  %v2391_v34 = vcombine.low %v837_v32, %v837_v32  ;;  %v2392_v35 = vcombine.high %v837_v32, %v837_v32  ;;  %v2393_v36 = vcombine.low %v838_v33, %v838_v33  ;;  %v2394_v37 = vcombine.high %v838_v33, %v838_v33 }
  0x3e   : > { %v2749_v2 = vld [vmem:[%s3588_s7 + $0x38] sm:$0xff]   ;;  %2499 = vmatprep.subr.bf16.mxu1 %v2748_v1  ;;  %v2752_v5 = vld [vmem:[%s3588_s7 + $0xf0] sm:$0xff]   ;;  %v2756_v9 = vld [vmem:[%s3588_s7 + $0xe8] sm:$0xff]  }
  0x3f   : > { %v2750_v3 = vld [vmem:[%s3588_s7 + $0xb8] sm:$0xff]   ;;  %2478 = vmatpush3.bf16.msra.mxu0 %v2749_v2  ;;  %v2753_v6 = vld [vmem:[%s3588_s7 + $0x30] sm:$0xff]   ;;  %v2757_v10 = vld [vmem:[%s3588_s7 + $0x28] sm:$0xff]   ;;  %1142 = vmatprep.mubr.bf16.mxu0 %v2392_v35 }
  0x40   : > { %2500 = vmatpush3.bf16.msra.mxu1 %v2750_v3  ;;  %2479 = vmatprep.subr.bf16.mxu0 %v2751_v4  ;;  %v2754_v7 = vld [vmem:[%s3588_s7 + $0xb0] sm:$0xff]   ;;  %v2758_v11 = vld [vmem:[%s3588_s7 + $0xa8] sm:$0xff]   ;;  %v2759_v12 = vld [vmem:[%s3588_s7 + $0x60] sm:$0xff]  }
  0x41   : > { %2501 = vmatprep.subr.bf16.mxu1 %v2752_v5  ;;  %v2760_v13 = vld [vmem:[%s3588_s7 + $0xe0] sm:$0xff]   ;;  %v2763_v16 = vld [vmem:[%s3588_s7 + $0x58] sm:$0xff]   ;;  %v2767_v20 = vld [vmem:[%s3588_s7 + $0x50] sm:$0xff]   ;;  %1182 = vmatprep.mubr.bf16.mxu1 %v2394_v37 }
  0x42   : > { %v2761_v14 = vld [vmem:[%s3588_s7 + $0x20] sm:$0xff]   ;;  %v2764_v17 = vld [vmem:[%s3588_s7 + $0xd8] sm:$0xff]   ;;  %v2768_v21 = vld [vmem:[%s3588_s7 + $0xd0] sm:$0xff]  }
  0x43   : > { %2480 = vmatpush3.bf16.msra.mxu0 %v2753_v6  ;;  %v2762_v15 = vld [vmem:[%s3588_s7 + $0xa0] sm:$0xff]   ;;  %v2765_v18 = vld [vmem:[%s3588_s7 + $0x18] sm:$0xff]   ;;  %v2769_v22 = vld [vmem:[%s3588_s7 + $0x10] sm:$0xff]  }
  0x44   : > { %2502 = vmatpush3.bf16.msra.mxu1 %v2754_v7  ;;  %2481 = vmatprep.subr.bf16.mxu0 %v2755_v8  ;;  %v2766_v19 = vld [vmem:[%s3588_s7 + $0x98] sm:$0xff]   ;;  %v2770_v23 = vld [vmem:[%s3588_s7 + $0x90] sm:$0xff]   ;;  %v2771_v24 = vld [vmem:[%s3588_s7 + $0x48] sm:$0xff]  }
  0x45   : > { %2503 = vmatprep.subr.bf16.mxu1 %v2756_v9  ;;  %v2772_v25 = vld [vmem:[%s3588_s7 + $0xc8] sm:$0xff]   ;;  %v2775_v28 = vld [vmem:[%s3588_s7 + $0x40] sm:$0xff]  }
  0x46   : > { %v2773_v26 = vld [vmem:[%s3588_s7 + $0x8] sm:$0xff]   ;;  %v2776_v29 = vld [vmem:[%s3588_s7 + $0xc0] sm:$0xff]  }
  0x47   : > { %2482 = vmatpush3.bf16.msra.mxu0 %v2757_v10  ;;  %v2774_v27 = vld [vmem:[%s3588_s7 + $0x88] sm:$0xff]   ;;  %v2777_v30 = vld [vmem:[%s3588_s7] sm:$0xff]  }
  0x48   : > { %2504 = vmatpush3.bf16.msra.mxu1 %v2758_v11  ;;  %2483 = vmatprep.subr.bf16.mxu0 %v2759_v12  ;;  %v2778_v31 = vld [vmem:[%s3588_s7 + $0x80] sm:$0xff]  }
  0x49   : > { %2505 = vmatprep.subr.bf16.mxu1 %v2760_v13  ;;  %v903_v40 = vld [vmem:[%s3589_s2] sm:$0xff] }
  0x4a   : > { %v2427_v61 = vld [vmem:[%s3590_s3] ss:$0 sm:$0xff] }
  0x4b   : > { %2484 = vmatpush3.bf16.msra.mxu0 %v2761_v14  ;;  %v2428_v63 = vld [vmem:[%s3591_s4] ss:$0 sm:$0xff] }
  0x4c   : > { %2506 = vmatpush3.bf16.msra.mxu1 %v2762_v15  ;;  %2485 = vmatprep.subr.bf16.mxu0 %v2763_v16 }
  0x4d   : > { %2507 = vmatprep.subr.bf16.mxu1 %v2764_v17 }
  0x4f   : > { %2486 = vmatpush3.bf16.msra.mxu0 %v2765_v18 }
  0x50   : > { %2508 = vmatpush3.bf16.msra.mxu1 %v2766_v19  ;;  %2487 = vmatprep.subr.bf16.mxu0 %v2767_v20 }
  0x51   : > { %2509 = vmatprep.subr.bf16.mxu1 %v2768_v21 }
  0x53   : > { %2488 = vmatpush3.bf16.msra.mxu0 %v2769_v22 }
  0x54   : > { %2510 = vmatpush3.bf16.msra.mxu1 %v2770_v23  ;;  %2489 = vmatprep.subr.bf16.mxu0 %v2771_v24 }
  0x55   : > { %2511 = vmatprep.subr.bf16.mxu1 %v2772_v25 }
  0x57   : > { %2490 = vmatpush3.bf16.msra.mxu0 %v2773_v26 }
  0x58   : > { %2512 = vmatpush3.bf16.msra.mxu1 %v2774_v27  ;;  %2491 = vmatprep.subr.bf16.mxu0 %v2775_v28 }
  0x59   : > { %2513 = vmatprep.subr.bf16.mxu1 %v2776_v29 }
  0x5b   : > { %2492 = vmatpush3.bf16.msra.mxu0 %v2777_v30 }
  0x5c   : > { %2514 = vmatpush3.bf16.msra.mxu1 %v2778_v31 }
  0x5e   : > { %1143 = vmatmul.mubr.bf16.vlgmr.msra.gmra.mxu0 %v2391_v34 }
  0x5f   : > { %1183 = vmatmul.mubr.bf16.vlgmr.msra.gmra.mxu1 %v2393_v36 }
 0x11e   : > { %v2493_v38 = vpop.f32.mrf.mxu0 }
 0x11f   : > { %v2515_v39 = vpop.f32.mrf.mxu1 }
 0x120   : > { %v2494_v41 = vpop.f32.mrf.mxu0 }
 0x121   : > { %v2516_v42 = vpop.f32.mrf.mxu1  ;;  %v2495_v43 = vadd.f32 %v2494_v41, %v2493_v38 }
 0x122   : > { %v2496_v44 = vpop.f32.mrf.mxu0  ;;  %v2517_v47 = vadd.f32 %v2516_v42, %v2515_v39 }
 0x123   : > { %v2518_v45 = vpop.f32.mrf.mxu1  ;;  %v1145_v46 = vadd.f32 %v2495_v43, %v903_v40 }
 0x124   : > { %v2497_v48 = vpop.f32.mrf.mxu0 }
 0x125   : > { %v2519_v49 = vpop.f32.mrf.mxu1  ;;  %v1185_v50 = vadd.f32 %v2517_v47, %v1145_v46 }
 0x127   : > { %v1193_v51 = vsel %vm1192_vm0, %v1185_v50, 0.0 }
 0x128   : > { %1194 = vadd.xlane.f32.xlu0 %v1193_v51 }
 0x1b1   : > { %v1195_v52 = vpop.xlane.xlu0 %1194 }
 0x1b2   : > { %v1197_v53 = vmul.f32 0.03125, %v1195_v52 }
 0x1b4   : > { %v1198_v54 = vsub.f32 %v1185_v50, %v1197_v53 }
 0x1b6   : > { %v1199_v55 = vmul.f32 %v1198_v54, %v1198_v54 }
 0x1b8   : > { %v1200_v56 = vsel %vm1192_vm0, %v1199_v55, 0.0 }
 0x1b9   : > { %1201 = vadd.xlane.f32.xlu0 %v1200_v56 }
 0x242   : > { %v1202_v57 = vpop.xlane.xlu0 %1201 }
 0x243   : > { %v1203_v58 = vmul.f32 0.03125, %v1202_v57 }
 0x245   : > { %v1204_v59 = vadd.f32 1e-05, %v1203_v58 }
 0x247   : > { %2783 = vrsqrt.f32 %v1204_v59 }
 0x254   : > { %v2784_v60 = vpop.eup %2783 }
 0x255   : > { %v1206_v62 = vmul.f32 %v2784_v60, %v1198_v54 }
 0x257   : > { %v1213_v0 = vmul.f32 %v2427_v61, %v1206_v62 }
 0x259   : > { %v1220_v1 = vadd.f32 %v2428_v63, %v1213_v0 }
 0x25b   : > { %1221 = vst.msk [vmem:[#allocation2] sm:$0xff] %vm1192_vm0, %v1220_v1 }
 0x25c PF: > { %vm1225_vm1 = vcmask 261120   ;;  %v2785_v9 = vld [vmem:[%s3140_s19 + $0x8] sm:$0xff]   ;;  %v2919_v10 = vmov 0.0   ;;  %vm2920_vm2 = vmmov 0   ;;  %v2786_v11 = vld [vmem:[%s3140_s19] sm:$0xff]   ;;  %s3592_s19 = scalar_lea.vmem %s3522_s5, %s3121_s1  ;;  %s3593_s6 = sld [smem:[#allocation25_spill]] }
 0x25d   : > { %2558 = vmatprep.subr.bf16.mxu0 %v2919_v10  ;;  %2562 = vmatprep.mubr.msk.bf16.mxu0 %vm2920_vm2, %v2919_v10  ;;  %v2429_v16 = vld [vmem:[%s3592_s19] ss:$0 sm:$0xff]  ;;  %s3595_s3 = scalar_lea.vmem %s3525_s8, %s3121_s1  ;;  %s2921_s21 = smov 120   ;;  %vm1325_vm3 = vcmask 64512   ;;  %vm1389_vm4 = vcmask 1043456   ;;  %vm1550_vm5 = vcmask 130112  }
 0x25e   : > { %2559 = vmatpush3.bf16.msra.mxu0 %v2785_v9  ;;  %2578 = vmatprep.subr.bf16.mxu1 %v2919_v10  ;;  %v2431_v22 = vld [vmem:[%s3595_s3] ss:$0 sm:$0xff]  ;;  %s2922_s23 = smov 96   ;;  %s2923_s4 = smov 88   ;;  %vm1667_vm6 = vcmask 195712   ;;  %vm1784_vm7 = vcmask 261312  }
 0x25f   : > { %2560 = vmatprep.subr.bf16.mxu0 %v2919_v10  ;;  %2580 = vmatprep.mubr.msk.bf16.mxu1 %vm2920_vm2, %v2919_v10  ;;  %s2924_s9 = smov 80   ;;  %s2925_s22 = smov 112  }
 0x260   : > { %s2926_s19 = smov 72   ;;  %s2927_s30 = smov 104  }
 0x261   : > { %s2928_s18 = smov 64   ;;  %s2931_s28 = smov 40  }
 0x262   : > { %v3294_v2 = vld [vmem:[#allocation2] sm:$0xff]  ;;  %2561 = vmatpush3.bf16.msra.mxu0 %v2786_v11  ;;  %s3594_s2 = scalar_lea.vmem %s3593_s6, %s3121_s1  ;;  %s2929_s6 = smov 56  }
 0x263   : > { %v1226_v3 = vsel %vm1225_vm1, %v3294_v2, 0.0  ;;  %2566 = vmatprep.subr.bf16.mxu0 %v2919_v10  ;;  %v2430_v18 = vld [vmem:[%s3594_s2] ss:$0 sm:$0xff]  ;;  %s2930_s2 = smov 48   ;;  %s2932_s24 = smov 8  }
 0x264   : > { %1227 = vadd.xlane.f32.xlu0 %v1226_v3  ;;  %s2933_s3 = smov 16  }
 0x2ed   : > { %v1228_v4 = vpop.xlane.xlu0 %1227 }
 0x2ee   : > { %v1230_v5 = vmul.f32 0.03125, %v1228_v4 }
 0x2f0   : > { %v1231_v6 = vsub.f32 %v3294_v2, %v1230_v5 }
 0x2f2   : > { %v1232_v7 = vmul.f32 %v1231_v6, %v1231_v6 }
 0x2f4   : > { %v1233_v8 = vsel %vm1225_vm1, %v1232_v7, 0.0 }
 0x2f5   : > { %1234 = vadd.xlane.f32.xlu0 %v1233_v8 }
 0x37e   : > { %v1235_v12 = vpop.xlane.xlu0 %1234 }
 0x37f   : > { %v1236_v13 = vmul.f32 0.03125, %v1235_v12 }
 0x381   : > { %v1237_v14 = vadd.f32 1e-05, %v1236_v13 }
 0x383   : > { %2799 = vrsqrt.f32 %v1237_v14 }
 0x390   : > { %v2800_v15 = vpop.eup %2799 }
 0x391   : > { %v1239_v17 = vmul.f32 %v2800_v15, %v1231_v6 }
 0x393   : > { %v1246_v19 = vmul.f32 %v2429_v16, %v1239_v17 }
 0x395   : > { %v1253_v20 = vadd.f32 %v2430_v18, %v1246_v19 }
 0x397   : > { %v1258_v21 = vpack.c.bf16 %v1253_v20, %v1253_v20 }
 0x399   : > { %2563 = vmatmul.mubr.msk.bf16.vlgmr.msra.gmra.mxu0 %vm1225_vm1, %v1258_v21 }
 0x39a   : > { %2568 = vmatprep.mubr.msk.bf16.mxu0 %vm2920_vm2, %v2919_v10 }
 0x459   : > { %v1315_v23 = vpop.f32.mrf.mxu0 }
 0x45a   : > { %v1316_v24 = vadd.f32 %v2431_v22, %v1315_v23 }
 0x45b   : > { %v2564_v25 = vpop.f32.mrf.mxu0 }
 0x45c   : > { %v3328_v26 = vpack.c.bf16 %v1316_v24, %v1316_v24 }
 0x45d   : > { %v1318_v27 = vpop.f32.mrf.mxu0 }
 0x45e   : > { %1435 = vrot.lane.b32.xlu0 %v3328_v26, %s2921_s21  ;;  %1323 = vrot.lane.b32.xlu1 %v3328_v26, %s2922_s23  ;;  %s2934_s21 = smov 24  }
 0x45f   : > { %v2565_v28 = vpop.f32.mrf.mxu0 }
 0x462   : > { %1437 = vrot.lane.b32.xlu1 %v3328_v26, %s2923_s4  ;;  %s3596_s4 = scalar_lea.vmem %s3527_s10, %s3121_s1 }
 0x466   : > { %1554 = vrot.lane.b32.xlu1 %v3328_v26, %s2924_s9 }
 0x46a   : > { %1552 = vrot.lane.b32.xlu1 %v3328_v26, %s2925_s22 }
 0x46e   : > { %1671 = vrot.lane.b32.xlu1 %v3328_v26, %s2926_s19  ;;  %s3597_s19 = scalar_lea.vmem %s3528_s11, %s3121_s1 }
 0x472   : > { %1669 = vrot.lane.b32.xlu1 %v3328_v26, %s2927_s30 }
 0x4d0   : > { %v1324_v29 = vpop.permute.xlu1 %1323  ;;  %v1436_v34 = vpop.permute.xlu0 %1435 }
 0x4d1   : > { %v1330_v30 = vsel %vm1325_vm3, %v1324_v29, 0 }
 0x4d2   : > { %2567 = vmatpush3.bf16.xpose.msra.mxu0 %v1330_v30 }
 0x4d3   : > { %2572 = vmatprep.subr.bf16.mxu0 %v2919_v10 }
 0x4d4   : > { %v1438_v31 = vpop.permute.xlu1 %1437 }
 0x4d5   : > { %v1443_v32 = vsel %vm1325_vm3, %v1438_v31, 0 }
 0x4d6   : > { %2579 = vmatpush3.bf16.xpose.msra.mxu1 %v1443_v32 }
 0x4d7   : > { %2590 = vmatprep.subr.bf16.mxu1 %v2919_v10 }
 0x4d8   : > { %v1555_v33 = vpop.permute.xlu1 %1554 }
 0x4d9   : > { %2569 = vmatmul.mubr.msk.bf16.vlgmr.msra.gmra.mxu0 %vm1325_vm3, %v3328_v26  ;;  %v1560_v36 = vsel %vm1325_vm3, %v1555_v33, 0 }
 0x4da   : > { %2574 = vmatprep.mubr.msk.bf16.mxu0 %vm2920_vm2, %v2919_v10 }
 0x4dc   : > { %v1553_v35 = vpop.permute.xlu1 %1552 }
 0x4dd   : > { %2581 = vmatmul.mubr.msk.bf16.vlgmr.msra.gmra.mxu1 %vm1325_vm3, %v1436_v34 }
 0x4de   : > { %2591 = vmatpush3.bf16.xpose.msra.mxu1 %v1560_v36  ;;  %2592 = vmatprep.mubr.msk.bf16.mxu1 %vm2920_vm2, %v2919_v10 }
 0x4df   : > { %2602 = vmatprep.subr.bf16.mxu1 %v2919_v10 }
 0x4e0   : > { %v1672_v37 = vpop.permute.xlu1 %1671 }
 0x4e1   : > { %v1677_v38 = vsel %vm1325_vm3, %v1672_v37, 0 }
 0x4e4   : > { %v1670_v39 = vpop.permute.xlu1 %1669 }
 0x4e5   : > { %2593 = vmatmul.mubr.msk.bf16.vlgmr.msra.gmra.mxu1 %vm1325_vm3, %v1553_v35 }
 0x4e6   : > { %2603 = vmatpush3.bf16.xpose.msra.mxu1 %v1677_v38  ;;  %2604 = vmatprep.mubr.msk.bf16.mxu1 %vm2920_vm2, %v2919_v10 }
 0x4e7   : > { %2614 = vmatprep.subr.bf16.mxu1 %v2919_v10 }
 0x4ed   : > { %2605 = vmatmul.mubr.msk.bf16.vlgmr.msra.gmra.mxu1 %vm1325_vm3, %v1670_v39 }
 0x4ee   : > { %2618 = vmatprep.mubr.msk.bf16.mxu1 %vm2920_vm2, %v2919_v10 }
 0x599   : > { %v1366_v40 = vpop.f32.mrf.mxu0 }
 0x59a   : > { %v1372_v41 = vmul.f32 0.35355338, %v1366_v40 }
 0x59b   : > { %v2570_v42 = vpop.f32.mrf.mxu0 }
 0x59c   : > { %v1373_v43 = vsel %vm1325_vm3, %v1372_v41, -inf }
 0x59d   : > { %v1479_v44 = vpop.f32.mrf.mxu1  ;;  %1374 = vmax.xlane.f32.xlu1 %v1373_v43  ;;  %v1369_v45 = vpop.f32.mrf.mxu0 }
 0x59e   : > { %v1485_v46 = vmul.f32 0.35355338, %v1479_v44 }
 0x59f   : > { %v2571_v47 = vpop.f32.mrf.mxu0  ;;  %v2582_v48 = vpop.f32.mrf.mxu1 }
 0x5a0   : > { %v1486_v49 = vsel %vm1325_vm3, %v1485_v46, -inf }
 0x5a1   : > { %1487 = vmax.xlane.f32.xlu0 %v1486_v49  ;;  %v1482_v50 = vpop.f32.mrf.mxu1 }
 0x5a2   : > { %v2787_v50 = vld [vmem:[%s3149_s27 + $0x8] sm:$0xff]  }
 0x5a3   : > { %v2583_v51 = vpop.f32.mrf.mxu1  ;;  %2615 = vmatpush3.bf16.msra.mxu1 %v2787_v50 }
 0x5a4   : > { %2616 = vmatprep.subr.bf16.mxu1 %v2919_v10 }
 0x5a5   : > { %v1596_v52 = vpop.f32.mrf.mxu1 }
 0x5a6   : > { %v1602_v62 = vmul.f32 0.35355338, %v1596_v52 }
 0x5a7   : > { %v2594_v53 = vpop.f32.mrf.mxu1 }
 0x5a8   : > { %v1603_v63 = vsel %vm1325_vm3, %v1602_v62, -inf  ;;  %v2788_v53 = vld [vmem:[%s3149_s27] sm:$0xff]  }
 0x5a9   : > { %v1599_v54 = vpop.f32.mrf.mxu1  ;;  %2617 = vmatpush3.bf16.msra.mxu1 %v2788_v53 }
 0x5aa   : > { %2630 = vmatprep.subr.bf16.mxu1 %v2919_v10 }
 0x5ab   : > { %v2595_v55 = vpop.f32.mrf.mxu1 }
 0x5ad   : > { %v1713_v56 = vpop.f32.mrf.mxu1 }
 0x5ae   : > { %v1719_v57 = vmul.f32 0.35355338, %v1713_v56  ;;  %1384 = vrot.lane.b32.xlu1 %v3328_v26, %s2928_s18 }
 0x5af   : > { %v2606_v58 = vpop.f32.mrf.mxu1 }
 0x5b0   : > { %v1720_v59 = vsel %vm1325_vm3, %v1719_v57, -inf }
 0x5b1   : > { %1721 = vmax.xlane.f32.xlu0 %v1720_v59  ;;  %v1716_v60 = vpop.f32.mrf.mxu1 }
 0x5b3   : > { %v2607_v61 = vpop.f32.mrf.mxu1 }
 0x5c7   : > { %1497 = vrot.lane.b32.xlu0 %v3328_v26, %s2929_s6 }
 0x5d2   : > { %1604 = vmax.xlane.f32.xlu1 %v1603_v63 }
 0x5e3   : > { %1614 = vrot.lane.b32.xlu1 %v3328_v26, %s2930_s2 }
 0x5e7   : > { %1731 = vrot.lane.b32.xlu1 %v3328_v26, %s2931_s28  ;;  %s3599_s28 = sld [smem:[#allocation10_spill]] }
 0x5ed   : > { %p2462_p1 = scmp.ne.s32.totalorder %s3599_s28, 1 }
 0x5ee   : > { %s3602_s9 = sld [smem:[#allocation28_spill]] (!%p2462_p1) }
 0x5ef   : > { %s3603_s30 = sld [smem:[#allocation29_spill]] (!%p2462_p1) }
 0x626   : > { %v1375_v0 = vpop.xlane.xlu1 %1374 }
 0x627   : > { %v1376_v1 = vsub.f32 %v1372_v41, %v1375_v0 }
 0x629   : > { %v1377_v3 = vmul.f32 1.442695, %v1376_v1 }
 0x62a   : > { %v1488_v4 = vpop.xlane.xlu0 %1487  ;;  %v1385_v5 = vpop.permute.xlu1 %1384 }
 0x62b   : > { %2801 = vpow2.f32 %v1377_v3  ;;  %v1489_v6 = vsub.f32 %v1485_v46, %v1488_v4  ;;  %v1391_v7 = vsel %vm1389_vm4, %v1385_v5, 0 }
 0x62c   : > { %2573 = vmatpush3.bf16.msra.mxu0 %v1391_v7  ;;  %v2446_v7 = vld [vmem:[%s3596_s4] ss:$0 sm:$0xff] }
 0x62d   : > { %v1490_v8 = vmul.f32 1.442695, %v1489_v6  ;;  %2584 = vmatprep.subr.bf16.mxu0 %v2919_v10 }
 0x62f   : > { %2803 = vpow2.f32 %v1490_v8 }
 0x638   : > { %v2802_v9 = vpop.eup %2801 }
 0x639   : > { %v1383_v11 = vpack.c.bf16 %v2802_v9, %v2802_v9  ;;  %v1379_v22 = vsel %vm1325_vm3, %v2802_v9, 0.0 }
 0x63a   : > { %v1722_v12 = vpop.xlane.xlu0 %1721 }
 0x63b   : > { %v1723_v13 = vsub.f32 %v1719_v57, %v1722_v12  ;;  %2575 = vmatmul.mubr.msk.bf16.vlgmr.msra.gmra.mxu0 %vm1325_vm3, %v1383_v11 }
 0x63c   : > { %v2804_v14 = vpop.eup %2803  ;;  %2586 = vmatprep.mubr.msk.bf16.mxu0 %vm2920_vm2, %v2919_v10 }
 0x63d   : > { %v1724_v15 = vmul.f32 1.442695, %v1723_v13  ;;  %v1492_v16 = vsel %vm1325_vm3, %v2804_v14, 0.0  ;;  %v1496_v19 = vpack.c.bf16 %v2804_v14, %v2804_v14 }
 0x63e   : > { %1493 = vadd.xlane.f32.xlu0 %v1492_v16  ;;  %v1498_v17 = vpop.permute.xlu0 %1497 }
 0x63f   : > { %2805 = vpow2.f32 %v1724_v15  ;;  %v1503_v18 = vsel %vm1389_vm4, %v1498_v17, 0 }
 0x640   : > { %2585 = vmatpush3.bf16.msra.mxu0 %v1503_v18 }
 0x641   : > { %2596 = vmatprep.subr.bf16.mxu0 %v2919_v10 }
 0x643   : > { %2587 = vmatmul.mubr.msk.bf16.vlgmr.msra.gmra.mxu0 %vm1325_vm3, %v1496_v19 }
 0x644   : > { %2598 = vmatprep.mubr.msk.bf16.mxu0 %vm2920_vm2, %v2919_v10 }
 0x64c   : > { %v2806_v20 = vpop.eup %2805 }
 0x64d   : > { %v1726_v21 = vsel %vm1325_vm3, %v2806_v20, 0.0  ;;  %v1730_v33 = vpack.c.bf16 %v2806_v20, %v2806_v20  ;;  %v2790_v20 = vld [vmem:[%s3166_s0] sm:$0xff]  }
 0x64e   : > { %1727 = vadd.xlane.f32.xlu0 %v1726_v21 }
 0x652   : > { %1380 = vadd.xlane.f32.xlu0 %v1379_v22 }
 0x65b   : > { %v1605_v23 = vpop.xlane.xlu1 %1604 }
 0x65c   : > { %v1606_v24 = vsub.f32 %v1602_v62, %v1605_v23 }
 0x65e   : > { %v1607_v25 = vmul.f32 1.442695, %v1606_v24 }
 0x65f   : > { %v1615_v26 = vpop.permute.xlu1 %1614 }
 0x660   : > { %2807 = vpow2.f32 %v1607_v25  ;;  %v1620_v27 = vsel %vm1389_vm4, %v1615_v26, 0  ;;  %v2447_v25 = vld [vmem:[%s3597_s19] ss:$0 sm:$0xff] }
 0x661   : > { %2597 = vmatpush3.bf16.msra.mxu0 %v1620_v27 }
 0x662   : > { %2608 = vmatprep.subr.bf16.mxu0 %v2919_v10 }
 0x663   : > { %v1732_v29 = vpop.permute.xlu1 %1731 }
 0x664   : > { %v1737_v32 = vsel %vm1389_vm4, %v1732_v29, 0 }
 0x66d   : > { %v2808_v28 = vpop.eup %2807 }
 0x66e   : > { %v1609_v30 = vsel %vm1325_vm3, %v2808_v28, 0.0  ;;  %v1613_v31 = vpack.c.bf16 %v2808_v28, %v2808_v28 }
 0x66f   : > { %1610 = vadd.xlane.f32.xlu1 %v1609_v30 }
 0x670   : > { %2599 = vmatmul.mubr.msk.bf16.vlgmr.msra.gmra.mxu0 %vm1325_vm3, %v1613_v31  ;;  %v2791_v31 = vld [vmem:[%s3180_s26 + $0x38] sm:$0xff]  }
 0x671   : > { %2609 = vmatpush3.bf16.msra.mxu0 %v1737_v32  ;;  %2610 = vmatprep.mubr.msk.bf16.mxu0 %vm2920_vm2, %v2919_v10  ;;  %v2792_v32 = vld [vmem:[%s3180_s26 + $0x30] sm:$0xff]  }
 0x672   : > { %2622 = vmatprep.subr.bf16.mxu0 %v2919_v10 }
 0x678   : > { %2611 = vmatmul.mubr.msk.bf16.vlgmr.msra.gmra.mxu0 %vm1325_vm3, %v1730_v33  ;;  %v2793_v33 = vld [vmem:[%s3180_s26 + $0x28] sm:$0xff]  }
 0x679   : > { %2626 = vmatprep.mubr.msk.bf16.mxu0 %vm2920_vm2, %v2919_v10 }
 0x6c7   : > { %v1494_v34 = vpop.xlane.xlu0 %1493 }
 0x6d7   : > { %v1728_v35 = vpop.xlane.xlu0 %1727 }
 0x6db   : > { %v1381_v36 = vpop.xlane.xlu0 %1380 }
 0x6dc   : > { %2809 = vrcp.f32 %v1381_v36  ;;  %v2796_v36 = vld [vmem:[%s3180_s26 + $0x10] sm:$0xff]  }
 0x6dd   : > { %2811 = vrcp.f32 %v1494_v34  ;;  %v2794_v34 = vld [vmem:[%s3180_s26 + $0x20] sm:$0xff]  }
 0x6e9   : > { %v2810_v37 = vpop.eup %2809 }
 0x6ea   : > { %v2812_v43 = vpop.eup %2811 }
 0x6f8   : > { %v1611_v49 = vpop.xlane.xlu1 %1610 }
 0x6f9   : > { %2813 = vrcp.f32 %v1611_v49 }
 0x6fa   : > { %2815 = vrcp.f32 %v1728_v35  ;;  %v2795_v35 = vld [vmem:[%s3180_s26 + $0x18] sm:$0xff]  }
 0x6fb   : > { %v1427_v38 = vpop.f32.mrf.mxu0 }
 0x6fc   : > { %v1433_v39 = vmul.f32 %v2810_v37, %v1427_v38  ;;  %v2797_v37 = vld [vmem:[%s3180_s26 + $0x8] sm:$0xff]   ;;  %v2798_v38 = vld [vmem:[%s3180_s26] sm:$0xff]  }
 0x6fd   : > { %v2576_v40 = vpop.f32.mrf.mxu0 }
 0x6fe   : > { %1434 = vst.msk [vmem:[#allocation3] sm:$0xff] %vm1325_vm3, %v1433_v39  ;;  %v2449_v39 = vld [vmem:[%s823_s29] ss:$0 sm:$0xff] }
 0x6ff   : > { %v1430_v41 = vpop.f32.mrf.mxu0 }
 0x701   : > { %v2577_v42 = vpop.f32.mrf.mxu0 }
 0x703   : > { %v1539_v44 = vpop.f32.mrf.mxu0 }
 0x704   : > { %v1545_v45 = vmul.f32 %v2812_v43, %v1539_v44 }
 0x705   : > { %v2588_v46 = vpop.f32.mrf.mxu0 }
 0x706   : > { %1547 = vrot.lane.b32.xlu1 %v1545_v45, %s2932_s24  ;;  %v2814_v51 = vpop.eup %2813  ;;  %s3600_s24 = sld [smem:[#allocation30_spill]] (!%p2462_p1) }
 0x707   : > { %v1542_v47 = vpop.f32.mrf.mxu0  ;;  %v2816_v58 = vpop.eup %2815 }
 0x709   : > { %v2589_v48 = vpop.f32.mrf.mxu0 }
 0x730   : > { %v1656_v52 = vpop.f32.mrf.mxu0 }
 0x731   : > { %v1662_v54 = vmul.f32 %v2814_v51, %v1656_v52 }
 0x732   : > { %v2600_v55 = vpop.f32.mrf.mxu0 }
 0x733   : > { %1664 = vrot.lane.b32.xlu0 %v1662_v54, %s2933_s3  ;;  %v2461_v55 = vld [vmem:[%s831_s20] ss:$0 sm:$0xff] }
 0x734   : > { %v1659_v56 = vpop.f32.mrf.mxu0 }
 0x736   : > { %v2601_v57 = vpop.f32.mrf.mxu0 }
 0x738   : > { %v1773_v59 = vpop.f32.mrf.mxu0 }
 0x739   : > { %v1779_v60 = vmul.f32 %v2816_v58, %v1773_v59 }
 0x73a   : > { %v2612_v61 = vpop.f32.mrf.mxu0 }
 0x73b   : > { %1781 = vrot.lane.b32.xlu1 %v1779_v60, %s2934_s21  ;;  %s3601_s21 = smov (!%p2462_p1), %s3600_s24 }
 0x73c   : > { %v1776_v62 = vpop.f32.mrf.mxu0 }
 0x73e   : > { %v2613_v63 = vpop.f32.mrf.mxu0 }
 0x778   : > { %v1548_v0 = vpop.permute.xlu1 %1547 }
 0x779   : > { %1551 = vst.msk [vmem:[#allocation3] sm:$0xff] %vm1550_vm5, %v1548_v0 }
 0x7a5   : > { %v1665_v1 = vpop.permute.xlu0 %1664 }
 0x7a6   : > { %1668 = vst.msk [vmem:[#allocation3] sm:$0xff] %vm1667_vm6, %v1665_v1 }
 0x7ad   : > { %v1782_v3 = vpop.permute.xlu1 %1781 }
 0x7ae   : > { %1785 = vst.msk [vmem:[#allocation3] sm:$0xff] %vm1784_vm7, %v1782_v3 }
 0x7b5   : > { %v1786_v4 = vld [vmem:[#allocation3] sm:$0xff] }
 0x7b6   : > { %v1791_v5 = vpack.c.bf16 %v1786_v4, %v1786_v4 }
 0x7b8   : > { %2619 = vmatmul.mubr.msk.bf16.vlgmr.msra.gmra.mxu1 %vm1225_vm1, %v1791_v5 }
 0x7b9   : > { %2646 = vmatprep.mubr.msk.bf16.mxu1 %vm2920_vm2, %v2919_v10  ;;  %2631 = vmatpush3.bf16.msra.mxu1 %v2791_v31 }
 0x7ba   : > { %2632 = vmatprep.subr.bf16.mxu1 %v2919_v10 }
 0x7bd   : > { %2633 = vmatpush3.bf16.msra.mxu1 %v2792_v32 }
 0x7be   : > { %2634 = vmatprep.subr.bf16.mxu1 %v2919_v10 }
 0x7c1   : > { %2635 = vmatpush3.bf16.msra.mxu1 %v2793_v33 }
 0x7c2   : > { %2636 = vmatprep.subr.bf16.mxu1 %v2919_v10 }
 0x7c5   : > { %2637 = vmatpush3.bf16.msra.mxu1 %v2794_v34 }
 0x7c6   : > { %2638 = vmatprep.subr.bf16.mxu1 %v2919_v10 }
 0x7c9   : > { %2639 = vmatpush3.bf16.msra.mxu1 %v2795_v35 }
 0x7ca   : > { %2640 = vmatprep.subr.bf16.mxu1 %v2919_v10 }
 0x7cd   : > { %2641 = vmatpush3.bf16.msra.mxu1 %v2796_v36 }
 0x7ce   : > { %2642 = vmatprep.subr.bf16.mxu1 %v2919_v10 }
 0x7d1   : > { %2643 = vmatpush3.bf16.msra.mxu1 %v2797_v37 }
 0x7d2   : > { %2644 = vmatprep.subr.bf16.mxu1 %v2919_v10 }
 0x7d5   : > { %2645 = vmatpush3.bf16.msra.mxu1 %v2798_v38 }
 0x878   : > { %v1841_v6 = vpop.f32.mrf.mxu1 }
 0x879   : > { %v1847_v8 = vadd.f32 %v1841_v6, %v3294_v2  ;;  %v2789_v2 = vld [vmem:[%s3166_s0 + $0x8] sm:$0xff]   ;;  %s3598_s0 = scalar_lea.vmem %s3529_s12, %s3121_s1 }
 0x87a   : > { %v2620_v9 = vpop.f32.mrf.mxu1  ;;  %2623 = vmatpush3.bf16.msra.mxu0 %v2789_v2  ;;  %v2448_v27 = vld [vmem:[%s3598_s0] ss:$0 sm:$0xff] }
 0x87b   : > { %v3404_v11 = vadd.f32 %v2446_v7, %v1847_v8  ;;  %2624 = vmatprep.subr.bf16.mxu0 %v2919_v10 }
 0x87c   : > { %v1844_v12 = vpop.f32.mrf.mxu1 }
 0x87d   : > { %v1858_v13 = vsel %vm1225_vm1, %v3404_v11, 0.0 }
 0x87e   : > { %1859 = vadd.xlane.f32.xlu1 %v1858_v13  ;;  %v2621_v14 = vpop.f32.mrf.mxu1  ;;  %2625 = vmatpush3.bf16.msra.mxu0 %v2790_v20 }
 0x907   : > { %v1860_v15 = vpop.xlane.xlu1 %1859 }
 0x908   : > { %v1861_v16 = vmul.f32 0.03125, %v1860_v15 }
 0x90a   : > { %v1862_v17 = vsub.f32 %v3404_v11, %v1861_v16 }
 0x90c   : > { %v1863_v18 = vmul.f32 %v1862_v17, %v1862_v17 }
 0x90e   : > { %v1864_v19 = vsel %vm1225_vm1, %v1863_v18, 0.0 }
 0x90f   : > { %1865 = vadd.xlane.f32.xlu0 %v1864_v19 }
 0x998   : > { %v1866_v21 = vpop.xlane.xlu0 %1865 }
 0x999   : > { %v1867_v22 = vmul.f32 0.03125, %v1866_v21 }
 0x99b   : > { %v1868_v23 = vadd.f32 1e-05, %v1867_v22 }
 0x99d   : > { %2817 = vrsqrt.f32 %v1868_v23 }
 0x9aa   : > { %v2818_v24 = vpop.eup %2817 }
 0x9ab   : > { %v1870_v26 = vmul.f32 %v2818_v24, %v1862_v17 }
 0x9ad   : > { %v1877_v28 = vmul.f32 %v2447_v25, %v1870_v26 }
 0x9af   : > { %v1884_v29 = vadd.f32 %v2448_v27, %v1877_v28 }
 0x9b1   : > { %v1889_v30 = vpack.c.bf16 %v1884_v29, %v1884_v29 }
 0x9b3   : > { %2627 = vmatmul.mubr.msk.bf16.vlgmr.msra.gmra.mxu0 %vm1225_vm1, %v1889_v30 }
 0xa73   : > { %v1946_v40 = vpop.f32.mrf.mxu0 }
 0xa74   : > { %v1947_v41 = vadd.f32 %v2449_v39, %v1946_v40 }
 0xa75   : > { %v2628_v42 = vpop.f32.mrf.mxu0 }
 0xa76   : > { %v1953_v43 = vmul.f32 0.044715, %v1947_v41  ;;  %v1952_v10 = vmul.f32 0.5, %v1947_v41 }
 0xa77   : > { %v1949_v44 = vpop.f32.mrf.mxu0 }
 0xa78   : > { %v1954_v45 = vmul.f32 %v1953_v43, %v1947_v41 }
 0xa79   : > { %v2629_v46 = vpop.f32.mrf.mxu0 }
 0xa7a   : > { %v1955_v47 = vmul.f32 %v1954_v45, %v1947_v41 }
 0xa7c   : > { %v1956_v48 = vadd.f32 %v1955_v47, %v1947_v41 }
 0xa7e   : > { %v1957_v49 = vmul.f32 0.7978846, %v1956_v48 }
 0xa80   : > { %2819 = vtanh.f32 %v1957_v49 }
 0xa8d   : > { %v2820_v50 = vpop.eup %2819 }
 0xa8e   : > { %v1959_v51 = vadd.f32 1.0, %v2820_v50 }
 0xa90   : > { %v1960_v52 = vmul.f32 %v1959_v51, %v1952_v10 }
 0xa92   : > { %v1977_v53 = vpack.c.bf16 %v1960_v52, %v1960_v52 }
 0xa94   : > { %2647 = vmatmul.mubr.bf16.vlgmr.msra.gmra.mxu1 %v1977_v53 }
 0xb54   : > { %v2060_v54 = vpop.f32.mrf.mxu1 }
 0xb55   : > { %v2066_v56 = vadd.f32 %v2060_v54, %v3404_v11 }
 0xb56   : > { %v2648_v57 = vpop.f32.mrf.mxu1  ;;  %2079 = sbr.rel (%p2462_p1) target bundleno = 3416 (0xd58), region = 108 }
 0xb57   : > { %v2074_v58 = vadd.f32 %v2461_v55, %v2066_v56 }
 0xb58   : > { %v2063_v59 = vpop.f32.mrf.mxu1 }
 0xb59   : > { %2075 = vst.msk [vmem:[#allocation2] sm:$0xff] %vm1225_vm1, %v2074_v58 }
 0xb5a   : > { %v2649_v60 = vpop.f32.mrf.mxu1 }
 0xb5b   : > { %v2082_v61 = vsel %vm1225_vm1, %v2074_v58, 0.0  ;;  %v2821_v4 = vld [vmem:[%s3600_s24 + $0x8] sm:$0xff]   ;;  %v2935_v5 = vmov 0.0   ;;  %vm2936_vm8 = vmmov 0   ;;  %v2822_v6 = vld [vmem:[%s3601_s21] sm:$0xff]  }
 0xb5c   : > { %2083 = vadd.xlane.f32.xlu0 %v2082_v61  ;;  %2650 = vmatprep.subr.bf16.mxu0 %v2935_v5  ;;  %v2463_v12 = vld [vmem:[%s3602_s9] ss:$0 sm:$0xff] }
 0xb5d   : > { %2654 = vmatprep.mubr.msk.bf16.mxu0 %vm2936_vm8, %v2935_v5  ;;  %2651 = vmatpush3.bf16.msra.mxu0 %v2821_v4  ;;  %v2464_v14 = vld [vmem:[%s3603_s30] ss:$0 sm:$0xff] }
 0xb5e   : > { %2652 = vmatprep.subr.bf16.mxu0 %v2935_v5 }
 0xb61   : > { %2653 = vmatpush3.bf16.msra.mxu0 %v2822_v6 }
 0xbe5   : > { %v2084_v62 = vpop.xlane.xlu0 %2083 }
 0xbe6   : > { %v2085_v63 = vmul.f32 0.03125, %v2084_v62 }
 0xbe8   : > { %v2086_v0 = vsub.f32 %v2074_v58, %v2085_v63 }
 0xbea   : > { %v2087_v1 = vmul.f32 %v2086_v0, %v2086_v0 }
 0xbec   : > { %v2088_v3 = vsel %vm1225_vm1, %v2087_v1, 0.0 }
 0xbed   : > { %2089 = vadd.xlane.f32.xlu0 %v2088_v3 }
 0xc76   : > { %v2090_v7 = vpop.xlane.xlu0 %2089 }
 0xc77   : > { %v2091_v8 = vmul.f32 0.03125, %v2090_v7 }
 0xc79   : > { %v2092_v9 = vadd.f32 1e-05, %v2091_v8 }
 0xc7b   : > { %2823 = vrsqrt.f32 %v2092_v9 }
 0xc88   : > { %v2824_v11 = vpop.eup %2823 }
 0xc89   : > { %v2094_v13 = vmul.f32 %v2824_v11, %v2086_v0 }
 0xc8b   : > { %v2101_v15 = vmul.f32 %v2463_v12, %v2094_v13 }
 0xc8d   : > { %v2108_v16 = vadd.f32 %v2464_v14, %v2101_v15 }
 0xc8f   : > { %v2113_v17 = vpack.c.bf16 %v2108_v16, %v2108_v16 }
 0xc91   : > { %2655 = vmatmul.mubr.msk.bf16.vlgmr.msra.gmra.mxu0 %vm1225_vm1, %v2113_v17 }
 0xd51   : > { %v2163_v18 = vpop.f32.mrf.mxu0 }
 0xd52   : > { %2169 = vst [vmem:[%s782_s17] sm:$0xff] %v2163_v18 }
 0xd53   : > { %v2656_v19 = vpop.f32.mrf.mxu0 }
 0xd55   : > { %v2166_v2 = vpop.f32.mrf.mxu0 }
 0xd57   : > { %v2657_v20 = vpop.f32.mrf.mxu0 }
 0xd58 PF: > { %s3604_s18 = sld [smem:[#allocation11_spill]]  ;;  %s2184_s20 = sshll.u32 %s782_s17, 4  ;;  %s2185_s20 = int_to_ptr.vmem [resolvable:$true] %s2184_s20 }
 0xd59   : > { %s3605_s0 = sld [smem:[#allocation8_spill]]  ;;  %s2825_s27 = scalar_lea.vmem %s2185_s20, 128 }
 0xd5a   : > { %s3607_s28 = sld [smem:[#allocation31_spill]]  ;;  %p2826_p2 = scmp.ne.s32.totalorder %s2185_s20, %s2825_s27 }
 0xd5b   : > { %s2937_s23 = smov [#allocation4]  }
 0xd5c   : > { %p2827_p4 = pnand %p2826_p2, %p3092_p3  ;;  %s2829_s4 = sshll.u32 %s2937_s23, 4  ;;  %s2830_s4 = int_to_ptr.vmem [resolvable:$false] %s2829_s4 }
 0xd5d   : > { %s2831_s9 = scalar_lea.vmem %s2830_s4, 256  ;;  %p2832_p6 = scmp.lt.s32.totalorder %s2185_s20, %s2830_s4 }
 0xd5e   : > { %s2469_s2 = sshll.u32 %s3604_s18, 7  ;;  %p2828_p5 = pneg %p2827_p4 }
 0xd5f   : > { %s3608_s24 = sand.u32 1, %s3605_s0   ;;  %p2833_p7 = scmp.lt.s32.totalorder %s2831_s9, %s2825_s27 }
 0xd60   : > { %s2182_s1 = scalar_lea.hbm %s3607_s28, %s2469_s2  ;;  %s2171_s3 = scalar_lea.sflag [#allocation5], %s3608_s24 }
 0xd61   : > { %p2834_p8 = por %p2833_p7, %p2832_p6 }
 0xd63   : > { %p2835_p10 = pnand %p2834_p8, %p2828_p5 }
 0xd65   : > { %2838 = shalt.err (!%p2835_p10)
}
 0xd66   : > { %s2839_s22 = scalar_lea.hbm %s2182_s1, 128  ;;  %s2843_s19 = scalar_lea.hbm %s3607_s28, 256 }
 0xd67   : > { %p2840_p11 = scmp.ne.s32.totalorder %s2182_s1, %s2839_s22  ;;  %p2844_p0 = scmp.lt.s32.totalorder %s2182_s1, %s3607_s28 }
 0xd68   : > { %p2845_p1 = scmp.lt.s32.totalorder %s2843_s19, %s2839_s22 }
 0xd69   : > { %p2841_p12 = pnand %p2840_p11, %p3092_p3 }
 0xd6a   : > { %p2846_p2 = por %p2845_p1, %p2844_p0 }
 0xd6b   : > { %p2842_p13 = pneg %p2841_p12 }
 0xd6d   : > { %p2847_p4 = pnand %p2846_p2, %p2842_p13 }
 0xd6f   : > { %2850 = shalt.err (!%p2847_p4)
}
 0xd70   : > { %2658 = dma.vmem_to_hbm [thread:$0]  (%p3092_p3), %s2185_s20, 128, %s2182_s1, %s2171_s3  }
 0xd71 PF: > { %s3609_s0 = sld [smem:[#allocation14_spill]] }
 0xd72   : > { %s3610_s2 = sld [smem:[#allocation7_spill]] }
 0xd77   : > { %p2664_p5 = scmp.ge.s32.totalorder %s3609_s0, 2 }
 0xd78   : > { %s2196_s29 = sand.u32 1, %s3610_s2  }
 0xd79   : > { %p2661_p6 = pnand %p2664_p5, %p3102_p9  ;;  %s2197_s24 = scalar_lea.sflag [#allocation5], %s2196_s29 }
 0xd7b   : > { %p2662_p7 = pneg %p2661_p6 }
 0xd7d   : > { %2884 = dma.done.wait (%p2662_p7), %s2197_s24, 128  }
 0xd7e   : > { %2886 = vsyncadd (%p2662_p7), %s2197_s24, 4294967168  ;;  %s33_s26 = sadd.s32 1, %s3609_s0   ;;  %s3612_s1 = sld [smem:[#allocation8_spill]] }
 0xd7f   : > { %p30_p8 = scmp.ge.s32.totalorder %s33_s26, 6   ;;  %s3613_s22 = sld [smem:[#allocation9_spill]] }
 0xd80   : > { %s3614_s23 = sld [smem:[#allocation19_spill]] }
 0xd81   : > { %s3615_s24 = sld [smem:[#allocation12_spill]]  ;;  %32 = sbr.rel (!%p30_p8) target bundleno = 18 (0x12), region = 179 }
 0xd82   : > { %s3616_s2 = sld [smem:[#allocation13_spill]] }
 0xd83   : > { %s3617_s25 = sld [smem:[#allocation15_spill]] }
 0xd84   : > { %s3618_s3 = sld [smem:[#allocation17_spill]] }
 0xd86   :  { %2202 = vsyncpa [#allocation5], 1 }
 0xd87   :  { %2204 = vsyncpa [#allocation5 + $0x1], 1 }

</bundles_post_ra>
